<compile_context>
chip_gen: v7x
topology: tpu7x:2x2x1
jax: 0.10.0
libtpu: 0.0.40
codegen_flags: <defaults>
</compile_context>

<pallas_src>
import jax
import jax.numpy as jnp
from jax.experimental import pallas as pl
from jax.experimental.pallas import tpu as pltpu


def _round_up(v, m):
    return ((v + m - 1) // m) * m


def _matmul_kernel_f32_out(x_ref, y_ref, o_ref):
    """f32 output: accumulate straight into the (VMEM-resident) output block."""
    @pl.when(pl.program_id(2) == 0)
    def _():
        o_ref[...] = jnp.zeros_like(o_ref)

    o_ref[...] += jnp.dot(
        x_ref[...], y_ref[...], preferred_element_type=jnp.float32
    )


def _matmul_kernel_acc(x_ref, y_ref, o_ref, acc_ref):
    """Narrow output dtypes: f32 scratch accumulator, cast once at k == last."""
    @pl.when(pl.program_id(2) == 0)
    def _():
        acc_ref[...] = jnp.zeros_like(acc_ref)

    acc_ref[...] += jnp.dot(
        x_ref[...], y_ref[...], preferred_element_type=jnp.float32
    )

    @pl.when(pl.program_id(2) == pl.num_programs(2) - 1)
    def _():
        o_ref[...] = acc_ref[...].astype(o_ref.dtype)


def _vmem_cap_bytes():
    """~75% of per-core physical VMEM (headroom for Mosaic internal scratch)."""
    try:
        info = pltpu.get_tpu_info()
        cap = getattr(info, "vmem_capacity_bytes", None)
        if cap:
            return int(cap) * 3 // 4
    except Exception:
        pass
    # Conservative fallback: safe on v7x (64 MiB physical) and on v5e/v6e.
    return 48 * 1024 * 1024


def _pick_tiles(M, N, K):
    """Big, lane-dense tiles; collapse tiny dims into a single block."""
    tm = min(512, _round_up(M, 8))
    tn = min(512, _round_up(N, 128))
    tk = min(512, _round_up(K, 128))
    # v7x megacore: keep at least one "parallel" grid axis >= 2 when it is
    # cheap to do so, so the grid can be sharded across both TensorCores.
    if (pl.cdiv(M, tm) == 1 and pl.cdiv(N, tn) == 1
            and tn % 256 == 0 and N > tn // 2):
        tn //= 2
    return tm, tn, tk


def myat_matmul(x, y, *, use_bf16_mxu=False):
    """out = x @ y via a tiled, auto-pipelined Pallas TPU kernel."""
    assert x.ndim == 2 and y.ndim == 2, "kernel handles 2-D matmul"
    M, K = x.shape
    K2, N = y.shape
    assert K == K2, f"inner dims must match, got {K} vs {K2}"

    out_dtype = jnp.promote_types(x.dtype, y.dtype)
    if use_bf16_mxu:
        # Optional precision knob: feed the MXU bf16 (3-4x peak on v6e/v7x);
        # accumulation stays f32.  Off by default since it changes numerics.
        x = x.astype(jnp.bfloat16)
        y = y.astype(jnp.bfloat16)

    tm, tn, tk = _pick_tiles(M, N, K)

    # Only K needs padding (garbage in the K remainder would corrupt valid
    # output rows/cols).  M/N remainders are handled by Pallas edge blocks:
    # out-of-bounds output stores are masked, and garbage rows of x / cols of
    # y only feed those masked regions.
    Kp = pl.cdiv(K, tk) * tk
    if Kp != K:
        x = jnp.pad(x, ((0, 0), (0, Kp - K)))
        y = jnp.pad(y, ((0, Kp - K), (0, 0)))

    gm, gn, gk = pl.cdiv(M, tm), pl.cdiv(N, tn), Kp // tk

    x_item = jnp.dtype(x.dtype).itemsize
    y_item = jnp.dtype(y.dtype).itemsize
    o_item = jnp.dtype(out_dtype).itemsize

    if out_dtype == jnp.float32:
        kernel = _matmul_kernel_f32_out
        scratch_shapes = []
    else:
        kernel = _matmul_kernel_acc
        scratch_shapes = [pltpu.VMEM((tm, tn), jnp.float32)]

    # VMEM actually needed: double-buffered in/out tiles (+ f32 scratch).
    needed = 2 * (tm * tk * x_item + tk * tn * y_item + tm * tn * o_item)
    if scratch_shapes:
        needed += tm * tn * 4
    vmem_limit = int(min(_vmem_cap_bytes(), max(2 * needed, 32 * 1024 * 1024)))

    # bytes_accessed reflects the streaming pattern: x is re-read once per
    # N-tile, y once per M-tile, out written once.
    cost = pl.CostEstimate(
        flops=2 * M * N * Kp,
        transcendentals=0,
        bytes_accessed=(M * Kp * x_item * gn
                        + Kp * N * y_item * gm
                        + M * N * o_item),
    )

    return pl.pallas_call(
        kernel,
        out_shape=jax.ShapeDtypeStruct((M, N), out_dtype),
        grid_spec=pltpu.PrefetchScalarGridSpec(
            num_scalar_prefetch=0,
            grid=(gm, gn, gk),
            in_specs=[
                pl.BlockSpec((tm, tk), lambda i, j, k: (i, k)),
                # If profiling ever shows exposed rhs DMA at very large K,
                # add pipeline_mode=pl.Buffered(3) on this spec.
                pl.BlockSpec((tk, tn), lambda i, j, k: (k, j)),
            ],
            out_specs=pl.BlockSpec((tm, tn), lambda i, j, k: (i, j)),
            scratch_shapes=scratch_shapes,
        ),
        compiler_params=pltpu.CompilerParams(
            dimension_semantics=("parallel", "parallel", "arbitrary"),
            vmem_limit_bytes=vmem_limit,
        ),
        cost_estimate=cost,
    )(x, y)


if __name__ == "__main__":
    # Small, tile-aligned shapes.  Tile selection collapses K into one block
    # (tk = 512) and splits N into two 256-wide tiles so a parallel grid axis
    # has extent >= 2; grid = (1, 2, 1).
    M, K, N = 256, 512, 512

    key = jax.random.PRNGKey(0)
    kx, ky = jax.random.split(key, 2)
    x = jax.random.normal(kx, (M, K), dtype=jnp.float32) * 0.1
    y = jax.random.normal(ky, (K, N), dtype=jnp.float32) * 0.1

    out = jax.block_until_ready(myat_matmul(x, y))

    # Plain-JAX reference for a sanity check.
    ref = jnp.dot(x, y, preferred_element_type=jnp.float32)
    assert out.shape == (M, N)
    assert jnp.allclose(out, ref, atol=1e-2, rtol=1e-2), (
        float(jnp.max(jnp.abs(out - ref)))
    )

    print("KERNEL_OK")
</pallas_src>

<mosaic_0001>
module attributes {stable_mosaic.version = 11 : i64} {
  func.func @_matmul_kernel_f32_out(%arg0: i32, %arg1: i32, %arg2: i32, %arg3: memref<256x512xf32, #tpu.memory_space<vmem>>, %arg4: memref<512x256xf32, #tpu.memory_space<vmem>>, %arg5: memref<256x256xf32, #tpu.memory_space<vmem>>) attributes {dimension_semantics = [#tpu.dimension_semantics<parallel>, #tpu.dimension_semantics<parallel>, #tpu.dimension_semantics<arbitrary>], iteration_bounds = array<i64: 1, 2, 1>, scalar_prefetch = 0 : i64, scratch_operands = 0 : i64, tpu.core_type = #tpu.core_type<tc>, window_params = [{transform_indices = @transform_0, window_bounds = array<i64: 256, 512>}, {transform_indices = @transform_1, window_bounds = array<i64: 512, 256>}, {transform_indices = @transform_2, window_bounds = array<i64: 256, 256>}]} {
    %c0_i32 = arith.constant 0 : i32
    %0 = arith.cmpi eq, %arg2, %c0_i32 : i32
    %1 = arith.extui %0 : i1 to i32
    %c0_i32_0 = arith.constant 0 : i32
    %2 = arith.cmpi ne, %1, %c0_i32_0 : i32
    scf.if %2 {
      %cst_8 = arith.constant 0.000000e+00 : f32
      %9 = vector.broadcast %cst_8 : f32 to vector<256x256xf32>
      %c0_9 = arith.constant 0 : index
      %c0_10 = arith.constant 0 : index
      %10 = vector.load %arg5[%c0_9, %c0_10] : memref<256x256xf32, #tpu.memory_space<vmem>>, vector<256x256xf32>
      tpu.vector_store %arg5[%c0_9, %c0_10], %9 {strides = array<i32>} : memref<256x256xf32, #tpu.memory_space<vmem>>, vector<256x256xf32>,
    } else {
    }
    %c0 = arith.constant 0 : index
    %c0_1 = arith.constant 0 : index
    %3 = vector.load %arg5[%c0, %c0_1] : memref<256x256xf32, #tpu.memory_space<vmem>>, vector<256x256xf32>
    %c0_2 = arith.constant 0 : index
    %c0_3 = arith.constant 0 : index
    %4 = vector.load %arg3[%c0_2, %c0_3] : memref<256x512xf32, #tpu.memory_space<vmem>>, vector<256x512xf32>
    %c0_4 = arith.constant 0 : index
    %c0_5 = arith.constant 0 : index
    %5 = vector.load %arg4[%c0_4, %c0_5] : memref<512x256xf32, #tpu.memory_space<vmem>>, vector<512x256xf32>
    %cst = arith.constant dense<0.000000e+00> : vector<256x256xf32>
    %6 = tpu.matmul %4, %5, %cst {dimension_numbers = #tpu.dot_dimension_numbers<[1], [0], [0], [1], [0, 0, 1, 1], [], []>} : vector<256x512xf32>, vector<512x256xf32>, vector<256x256xf32> -> vector<256x256xf32>
    %7 = arith.addf %3, %6 : vector<256x256xf32>
    %c0_6 = arith.constant 0 : index
    %c0_7 = arith.constant 0 : index
    %8 = vector.load %arg5[%c0_6, %c0_7] : memref<256x256xf32, #tpu.memory_space<vmem>>, vector<256x256xf32>
    tpu.vector_store %arg5[%c0_6, %c0_7], %7 {strides = array<i32>} : memref<256x256xf32, #tpu.memory_space<vmem>>, vector<256x256xf32>,
    return
  }
  func.func @transform_0(%arg0: i32, %arg1: i32, %arg2: i32) -> (i32, i32) {
    %c0_i32 = arith.constant 0 : i32
    return %arg0, %arg2 : i32, i32
  }
  func.func @transform_1(%arg0: i32, %arg1: i32, %arg2: i32) -> (i32, i32) {
    %c0_i32 = arith.constant 0 : i32
    return %arg2, %arg1 : i32, i32
  }
  func.func @transform_2(%arg0: i32, %arg1: i32, %arg2: i32) -> (i32, i32) {
    %c0_i32 = arith.constant 0 : i32
    return %arg0, %arg1 : i32, i32
  }
}

</mosaic_0001>

<bundles_post_ra>
// kernel: tpu_custom_call.1
= control target key start
LH: loop header
LB: loop body
LE: loop exit
PB: predicated region body
PF: predicated region fallthrough
CT: control target
= control target key end

     0   :  { %7 = vsyncpa [#allocation3], 0  ;;  %s2260_s0 = inlined_call_operand.hbm [shape: f32[256,512], index: 0, kind: input, shape index: {}]   ;;  %s2261_s1 = inlined_call_operand.hbm [shape: f32[512,512], index: 1, kind: input, shape index: {}]   ;;  %s2262_s2 = inlined_call_operand.hbm [shape: f32[256,512], index: 2, kind: output, shape index: {}]  }
   0x1   :  { %8 = vsyncpa [#allocation6], 0 }
   0x2   :  { %10 = vsyncpa [#allocation6 + $0x1], 0 }
   0x3   :  { %11 = vsyncpa [#allocation4], 0 }
   0x4   :  { %13 = vsyncpa [#allocation4 + $0x1], 0  ;;  %s1839_s9 = smov 0   ;;  %s1841_s10 = smov 0  }
   0x5   :  { %s1843_s11 = smov 0   ;;  %s1845_s12 = smov 0  }
   0x6   :  { %s1847_s13 = smov 0   ;;  %s1849_s14 = smov 0  }
   0x7 LB: > { %s1376_s15 = sadd.s32 4294967295, %s1812_s14   ;;  %s1377_s16 = sadd.s32 4294967294, %s1812_s14   ;;  %s1812_s14 = sphi %s1849_s14, %s19_s14   ;;  %s1808_s13 = sphi %s1847_s13, %s2288_s13   ;;  %s1804_s12 = sphi %s1845_s12, %s2287_s12   ;;  %s1800_s11 = sphi %s1843_s11, %s2286_s11   ;;  %s1796_s10 = sphi %s1841_s10, %s2285_s10   ;;  %s1792_s9 = sphi %s1839_s9, %s2284_s9  }
   0x8   : > { %p82_p0 = scmp.ne.s32.totalorder %s1800_s11, %s1796_s10  ;;  %p83_p1 = scmp.eq.s32.totalorder %s1812_s14, 0 }
   0x9   : > { %p88_p2 = scmp.ne.s32.totalorder %s1796_s10, %s1792_s9  ;;  %p1876_p3 = scmp.eq.s32.totalorder %s1376_s15, 0 }
   0xa   : > { %p1880_p4 = por %p83_p1, %p82_p0  ;;  %p114_p5 = scmp.eq.s32.totalorder %s1376_s15, 1 }
   0xb   : > { %s2269_s17 = scalar_select %p1876_p3, 1, 0 }
   0xc   : > { %p1886_p6 = por %p1876_p3, %p88_p2  ;;  %p120_p7 = scmp.eq.s32.totalorder %s1377_s16, 1 }
   0xd   : > { %p1890_p8 = por %p114_p5, %p82_p0  ;;  %p1378_p9 = scmp.ge.s32.totalorder %s1812_s14, 1 }
   0xe   : > { %s2271_s19 = scalar_select %p1886_p6, 1, 0 }
   0xf   : > { %s2272_s20 = scalar_select %p1890_p8, 1, 0 }
  0x10   : > { %p1895_p10 = por %p120_p7, %p88_p2  ;;  %p127_p11 = scmp.lt.s32.totalorder %s1812_s14, 3 }
  0x11   : > { %s1814_s23 = smov [#allocation2]   ;;  %p1608_p1 = scmp.lt.s32.totalorder %s1812_s14, 2 }
  0x12   : > { %s2273_s21 = scalar_select %p1895_p10, 1, 0 }
  0x13   : > { %p1900_p12 = pnand %p1378_p9, %p127_p11  ;;  %s145_s24 = sshll.u32 %s1814_s23, 4  ;;  %s1904_s24 = int_to_ptr.vmem [resolvable:$true] %s145_s24 }
  0x14   : > { %p1918_p2 = pnand %p1608_p1, %p1880_p4  ;;  %s34_s27 = sadd.s32 1, %s1808_s13 }
  0x15   : > { %s2274_s22 = scalar_select %p1900_p12, 1, 0 }
  0x16   : > { %p1595_p13 = pneg %p1900_p12  ;;  %s1668_s30 = scalar_lea.hbm %s2260_s0, 16384 }
  0x17   : > { %s2276_s26 = scalar_select %p1918_p2, 1, 0 }
  0x18   : > { %p1912_p5 = pnand %p1595_p13, %p1876_p3  ;;  %p1669_p7 = scmp.ne.s32.totalorder %s2260_s0, %s1668_s30 }
  0x19   : > { %p1675_p4 = scmp.lt.u32.totalorder %s1668_s30, %s2260_s0 }
  0x1a   : > { %p1670_p9 = pneg %p1912_p5 }
  0x1c   : > { %p1671_p11 = pnand %p1670_p9, %p1669_p7 }
  0x1e   : > { %p1672_p13 = pneg %p1671_p11 }
  0x20   : > { %p1677_p1 = pnand %p1675_p4, %p1672_p13 }
  0x22   : > { %1680 = shalt.err (!%p1677_p1)
}
  0x23   : > { %s1681_s7 = scalar_lea.vmem %s1904_s24, 16384  ;;  %p1689_p6 = scmp.lt.s32.totalorder %s1904_s24, %s1904_s24 }
  0x24   : > { %p1682_p0 = scmp.ne.s32.totalorder %s1904_s24, %s1681_s7  ;;  %p1690_p3 = scmp.lt.s32.totalorder %s1681_s7, %s1681_s7 }
  0x26   : > { %p1684_p10 = pnand %p1682_p0, %p1670_p9  ;;  %p1691_p12 = por %p1690_p3, %p1689_p6 }
  0x28   : > { %p1685_p8 = pneg %p1684_p10 }
  0x2a   : > { %p1692_p2 = pnand %p1691_p12, %p1685_p8 }
  0x2c   : > { %1695 = shalt.err (!%p1692_p2)
}
  0x2d   : > { %s1815_s8 = smov 512   ;;  %s1816_s15 = smov 32  }
  0x2e   : > { %1598 = dma.hbm_to_vmem [thread:$0]  (!%p1912_p5), %s2260_s0, 16384, %s1904_s24, [#allocation3], %s1815_s8, %s1815_s8, %s1816_s15  }
  0x2f   : > { %p36_p10 = scmp.ge.s32.totalorder %s34_s27, 2  ;;  %s75_s23 = sadd.s32 1, %s1800_s11 }
  0x30   : > { %s159_s28 = sand.u32 1, %s1800_s11   ;;  %s1393_s3 = sshll.u32 %s1808_s13, 8 }
  0x31   : > { %s2290_s27 = smov (%p36_p10, %s34_s27), 0  ;;  %s1381_s29 = sshll.u32 %s159_s28, 10 }
  0x32   : > { %s71_s30 = ssub.s32 %s1808_s13, %s2290_s27  ;;  %s1956_s5 = scalar_lea.hbm %s2261_s1, %s1393_s3 }
  0x33   : > { %p73_p3 = scmp.eq.s32.totalorder %s71_s30, 0  ;;  %s163_s24 = scalar_lea.vmem [#allocation5], %s1381_s29 }
  0x34   : > { %s173_s6 = sshll.u32 %s163_s24, 4  ;;  %s1963_s15 = scalar_lea.sflag [#allocation6], %s159_s28  ;;  %s1961_s6 = int_to_ptr.vmem [resolvable:$true] %s173_s6 }
  0x35   : > { %s1959_s7 = scalar_select %p73_p3, %s1800_s11, %s75_s23  }
  0x36   : > { %s1696_s16 = scalar_lea.hbm %s1956_s5, 16384  ;;  %p2277_p8 = scmp.ne.s32.totalorder %s2276_s26, 0 }
  0x37   : > { %p1697_p6 = scmp.ne.s32.totalorder %s1956_s5, %s1696_s16  ;;  %s1701_s3 = scalar_lea.hbm %s2261_s1, 32768 }
  0x38   : > { %p1698_p12 = pneg %p2277_p8  ;;  %p1702_p2 = scmp.lt.u32.totalorder %s1956_s5, %s2261_s1 }
  0x39   : > { %p1703_p7 = scmp.lt.u32.totalorder %s1701_s3, %s1696_s16  ;;  %p1705_p11 = scmp.lt.u32.totalorder %s1696_s16, %s1956_s5 }
  0x3a   : > { %p1699_p0 = pnand %p1698_p12, %p1697_p6 }
  0x3b   : > { %p1704_p9 = por %p1703_p7, %p1702_p2 }
  0x3c   : > { %p1700_p5 = pneg %p1699_p0 }
  0x3d   : > { %p1706_p13 = por %p1705_p11, %p1704_p9 }
  0x3f   : > { %p1707_p4 = pnand %p1706_p13, %p1700_p5 }
  0x41   : > { %1710 = shalt.err (!%p1707_p4)
}
  0x42   : > { %s1711_s23 = scalar_lea.vmem %s1961_s6, 16384  ;;  %s1817_s28 = smov [#allocation5]  }
  0x43   : > { %p1712_p1 = scmp.ne.s32.totalorder %s1961_s6, %s1711_s23  ;;  %s1716_s25 = sshll.u32 %s1817_s28, 4  ;;  %s1717_s25 = int_to_ptr.vmem [resolvable:$false] %s1716_s25 }
  0x44   : > { %s1718_s24 = scalar_lea.vmem %s1717_s25, 32768  ;;  %p1719_p6 = scmp.lt.s32.totalorder %s1961_s6, %s1717_s25 }
  0x45   : > { %p1714_p10 = pnand %p1712_p1, %p1698_p12  ;;  %p1720_p0 = scmp.lt.s32.totalorder %s1718_s24, %s1711_s23 }
  0x47   : > { %p1715_p3 = pneg %p1714_p10  ;;  %p1721_p2 = por %p1720_p0, %p1719_p6 }
  0x49   : > { %p1722_p7 = pnand %p1721_p2, %p1715_p3 }
  0x4b   : > { %1725 = shalt.err (!%p1722_p7)
}
  0x4c   : > { %s1818_s16 = smov 256   ;;  %s1819_s18 = smov 16  }
  0x4d   : > { %1602 = dma.hbm_to_vmem [thread:$0]  (!%p2277_p8), %s1956_s5, 16384, %s1961_s6, %s1963_s15, %s1815_s8, %s1818_s16, %s1819_s18  }
  0x4e   : > { %p2278_p12 = scmp.ne.s32.totalorder %s2274_s22, 0 }
  0x4f   : > { %p2279_p5 = scmp.ne.s32.totalorder (!%p2278_p12), %s2269_s17, 0 }
  0x50   : > { %185 = sbr.rel (%p2278_p12) target bundleno = 516 (0x204), region = 28 }
  0x57   : > { %1779 = dma.done.wait (%p2279_p5), [#allocation3], 16384  }
  0x58   : > { %1781 = vsyncadd (%p2279_p5), [#allocation3], 4294950912  ;;  %s1999_s30 = sand.u32 1, %s1796_s10   ;;  %p2280_p8 = scmp.ne.s32.totalorder %s2271_s19, 0 }
  0x59   : > { %s1386_s3 = sshll.u32 %s1999_s30, 10  ;;  %s192_s29 = scalar_lea.sflag [#allocation6], %s1999_s30 }
  0x5a   : > { %s2003_s26 = scalar_lea.vmem [#allocation5], %s1386_s3 }
  0x5b   : > { %1783 = dma.done.wait (%p2280_p8), %s192_s29, 16384  }
  0x5c   : > { %1785 = vsyncadd (%p2280_p8), %s192_s29, 4294950912  ;;  %v483_v0 = vld [vmem:[%s2003_s26 + $0x8] sm:$0xff]  ;;  %v485_v1 = vld [vmem:[%s2003_s26 + $0x18] sm:$0xff]  ;;  %s1387_s17 = sshll.u32 %s1999_s30, 9  ;;  %s1394_s22 = sshll.u32 %s1804_s12, 8 }
  0x5d   : > { %v547_v2 = vld [vmem:[%s2003_s26 + $0x208] sm:$0xff]  ;;  %v1395_v3 = vpack.c.bf16 %v485_v1, %v483_v0  ;;  %v549_v4 = vld [vmem:[%s2003_s26 + $0x218] sm:$0xff]  ;;  %v482_v5 = vld [vmem:[%s2003_s26] sm:$0xff]  ;;  %s2138_s19 = scalar_lea.vmem [#allocation7], %s1387_s17  ;;  %s2207_s15 = scalar_lea.hbm %s2262_s2, %s1394_s22 }
  0x5e   : > { %v484_v6 = vld [vmem:[%s2003_s26 + $0x10] sm:$0xff]  ;;  %v1459_v7 = vpack.c.bf16 %v549_v4, %v547_v2  ;;  %v546_v9 = vld [vmem:[%s2003_s26 + $0x200] sm:$0xff]  ;;  %v487_v11 = vld [vmem:[%s2003_s26 + $0x28] sm:$0xff]  ;;  %s1269_s8 = sshll.u32 %s2138_s19, 4  ;;  %s1253_s12 = scalar_lea.sflag [#allocation4], %s1999_s30  ;;  %s2209_s8 = int_to_ptr.vmem [resolvable:$true] %s1269_s8 }
  0x5f   : > { %v1397_v8 = vpack.c.bf16 %v484_v6, %v482_v5  ;;  %v548_v10 = vld [vmem:[%s2003_s26 + $0x210] sm:$0xff]  ;;  %1396 = vmatprep.subr.bf16.mxu1 %v1395_v3  ;;  %v489_v13 = vld [vmem:[%s2003_s26 + $0x38] sm:$0xff]  ;;  %v551_v14 = vld [vmem:[%s2003_s26 + $0x228] sm:$0xff]  ;;  %s1726_s4 = scalar_lea.vmem %s2209_s8, 8192  ;;  %p2281_p11 = scmp.ne.s32.totalorder %s2272_s20, 0 }
  0x60   : > { %v1461_v12 = vpack.c.bf16 %v548_v10, %v546_v9  ;;  %v553_v15 = vld [vmem:[%s2003_s26 + $0x238] sm:$0xff]  ;;  %1460 = vmatprep.subr.bf16.mxu0 %v1459_v7  ;;  %v1399_v16 = vpack.c.bf16 %v489_v13, %v487_v11  ;;  %v486_v18 = vld [vmem:[%s2003_s26 + $0x20] sm:$0xff]  ;;  %v488_v19 = vld [vmem:[%s2003_s26 + $0x30] sm:$0xff]  ;;  %p1727_p9 = scmp.ne.s32.totalorder %s2209_s8, %s1726_s4  ;;  %s1820_s23 = smov [#allocation7]  }
  0x61   : > { %1398 = vmatpush1.bf16.msra.mxu1 %v1397_v8  ;;  %v1463_v17 = vpack.c.bf16 %v553_v15, %v551_v14  ;;  %v550_v20 = vld [vmem:[%s2003_s26 + $0x220] sm:$0xff]  ;;  %v1401_v21 = vpack.c.bf16 %v488_v19, %v486_v18  ;;  %v552_v22 = vld [vmem:[%s2003_s26 + $0x230] sm:$0xff]  ;;  %v491_v23 = vld [vmem:[%s2003_s26 + $0x48] sm:$0xff]  ;;  %s1730_s28 = sshll.u32 %s1820_s23, 4  ;;  %s1731_s28 = int_to_ptr.vmem [resolvable:$false] %s1730_s28 }
  0x62   : > { %1462 = vmatpush1.bf16.msra.mxu0 %v1461_v12  ;;  %v493_v24 = vld [vmem:[%s2003_s26 + $0x58] sm:$0xff]  ;;  %1400 = vmatprep.subr.bf16.mxu1 %v1399_v16  ;;  %v1465_v25 = vpack.c.bf16 %v552_v22, %v550_v20  ;;  %v555_v27 = vld [vmem:[%s2003_s26 + $0x248] sm:$0xff]  ;;  %v490_v29 = vld [vmem:[%s2003_s26 + $0x40] sm:$0xff]  ;;  %p1728_p13 = pnand %p1727_p9, %p2281_p11  ;;  %s1732_s25 = scalar_lea.vmem %s1731_s28, 16384 }
  0x63   : > { %1464 = vmatprep.subr.bf16.mxu0 %v1463_v17  ;;  %v1403_v26 = vpack.c.bf16 %v493_v24, %v491_v23  ;;  %v557_v28 = vld [vmem:[%s2003_s26 + $0x258] sm:$0xff]  ;;  %v492_v31 = vld [vmem:[%s2003_s26 + $0x50] sm:$0xff]  ;;  %v554_v32 = vld [vmem:[%s2003_s26 + $0x240] sm:$0xff]  ;;  %p1733_p1 = scmp.lt.s32.totalorder %s2209_s8, %s1731_s28  ;;  %p1734_p10 = scmp.lt.s32.totalorder %s1732_s25, %s1726_s4 }
  0x64   : > { %v1467_v30 = vpack.c.bf16 %v557_v28, %v555_v27  ;;  %v556_v33 = vld [vmem:[%s2003_s26 + $0x250] sm:$0xff]  ;;  %v1405_v34 = vpack.c.bf16 %v492_v31, %v490_v29  ;;  %v495_v35 = vld [vmem:[%s2003_s26 + $0x68] sm:$0xff]  ;;  %v497_v36 = vld [vmem:[%s2003_s26 + $0x78] sm:$0xff]  ;;  %p1729_p4 = pneg %p1728_p13 }
  0x65   : > { %1402 = vmatpush1.bf16.msra.mxu1 %v1401_v21  ;;  %v559_v37 = vld [vmem:[%s2003_s26 + $0x268] sm:$0xff]  ;;  %v1469_v38 = vpack.c.bf16 %v556_v33, %v554_v32  ;;  %v1407_v39 = vpack.c.bf16 %v497_v36, %v495_v35  ;;  %v561_v40 = vld [vmem:[%s2003_s26 + $0x278] sm:$0xff]  ;;  %v494_v41 = vld [vmem:[%s2003_s26 + $0x60] sm:$0xff]  ;;  %p1735_p3 = por %p1734_p10, %p1733_p1 }
  0x66   : > { %1466 = vmatpush1.bf16.msra.mxu0 %v1465_v25  ;;  %1404 = vmatprep.subr.bf16.mxu1 %v1403_v26  ;;  %v496_v42 = vld [vmem:[%s2003_s26 + $0x70] sm:$0xff]  ;;  %v1471_v43 = vpack.c.bf16 %v561_v40, %v559_v37  ;;  %v558_v44 = vld [vmem:[%s2003_s26 + $0x260] sm:$0xff]  ;;  %v499_v46 = vld [vmem:[%s2003_s26 + $0x88] sm:$0xff] }
  0x67   : > { %1468 = vmatprep.subr.bf16.mxu0 %v1467_v30  ;;  %v560_v45 = vld [vmem:[%s2003_s26 + $0x270] sm:$0xff]  ;;  %v501_v47 = vld [vmem:[%s2003_s26 + $0x98] sm:$0xff]  ;;  %v563_v48 = vld [vmem:[%s2003_s26 + $0x288] sm:$0xff]  ;;  %v1409_v50 = vpack.c.bf16 %v496_v42, %v494_v41  ;;  %p1736_p6 = pnand %p1735_p3, %p1729_p4 }
  0x68   : > { %v565_v49 = vld [vmem:[%s2003_s26 + $0x298] sm:$0xff]  ;;  %v1473_v51 = vpack.c.bf16 %v560_v45, %v558_v44  ;;  %v1411_v52 = vpack.c.bf16 %v501_v47, %v499_v46  ;;  %v498_v53 = vld [vmem:[%s2003_s26 + $0x80] sm:$0xff]  ;;  %v500_v54 = vld [vmem:[%s2003_s26 + $0x90] sm:$0xff] }
  0x69   : > { %1406 = vmatpush1.bf16.msra.mxu1 %v1405_v34  ;;  %v562_v55 = vld [vmem:[%s2003_s26 + $0x280] sm:$0xff]  ;;  %v1475_v56 = vpack.c.bf16 %v565_v49, %v563_v48  ;;  %v564_v57 = vld [vmem:[%s2003_s26 + $0x290] sm:$0xff]  ;;  %v503_v58 = vld [vmem:[%s2003_s26 + $0xa8] sm:$0xff]  ;;  %v1413_v62 = vpack.c.bf16 %v500_v54, %v498_v53 }
  0x6a   : > { %1470 = vmatpush1.bf16.msra.mxu0 %v1469_v38  ;;  %1408 = vmatprep.subr.bf16.mxu1 %v1407_v39  ;;  %v505_v59 = vld [vmem:[%s2003_s26 + $0xb8] sm:$0xff]  ;;  %v567_v60 = vld [vmem:[%s2003_s26 + $0x2a8] sm:$0xff]  ;;  %v1477_v63 = vpack.c.bf16 %v564_v57, %v562_v55  ;;  %v502_v1 = vld [vmem:[%s2003_s26 + $0xa0] sm:$0xff] }
  0x6b   : > { %1472 = vmatprep.subr.bf16.mxu0 %v1471_v43  ;;  %v569_v61 = vld [vmem:[%s2003_s26 + $0x2b8] sm:$0xff]  ;;  %v1415_v0 = vpack.c.bf16 %v505_v59, %v503_v58  ;;  %v504_v2 = vld [vmem:[%s2003_s26 + $0xb0] sm:$0xff]  ;;  %v566_v3 = vld [vmem:[%s2003_s26 + $0x2a0] sm:$0xff] }
  0x6c   : > { %v1479_v4 = vpack.c.bf16 %v569_v61, %v567_v60  ;;  %v568_v5 = vld [vmem:[%s2003_s26 + $0x2b0] sm:$0xff]  ;;  %v507_v6 = vld [vmem:[%s2003_s26 + $0xc8] sm:$0xff]  ;;  %v509_v7 = vld [vmem:[%s2003_s26 + $0xd8] sm:$0xff]  ;;  %v1417_v10 = vpack.c.bf16 %v504_v2, %v502_v1 }
  0x6d   : > { %1410 = vmatpush1.bf16.msra.mxu1 %v1409_v50  ;;  %v571_v8 = vld [vmem:[%s2003_s26 + $0x2c8] sm:$0xff]  ;;  %v573_v9 = vld [vmem:[%s2003_s26 + $0x2d8] sm:$0xff]  ;;  %v1481_v11 = vpack.c.bf16 %v568_v5, %v566_v3  ;;  %v1419_v12 = vpack.c.bf16 %v509_v7, %v507_v6  ;;  %v506_v13 = vld [vmem:[%s2003_s26 + $0xc0] sm:$0xff] }
  0x6e   : > { %1474 = vmatpush1.bf16.msra.mxu0 %v1473_v51  ;;  %1412 = vmatprep.subr.bf16.mxu1 %v1411_v52  ;;  %v508_v14 = vld [vmem:[%s2003_s26 + $0xd0] sm:$0xff]  ;;  %v570_v15 = vld [vmem:[%s2003_s26 + $0x2c0] sm:$0xff]  ;;  %v1483_v16 = vpack.c.bf16 %v573_v9, %v571_v8  ;;  %v511_v18 = vld [vmem:[%s2003_s26 + $0xe8] sm:$0xff] }
  0x6f   : > { %1476 = vmatprep.subr.bf16.mxu0 %v1475_v56  ;;  %v572_v17 = vld [vmem:[%s2003_s26 + $0x2d0] sm:$0xff]  ;;  %v513_v19 = vld [vmem:[%s2003_s26 + $0xf8] sm:$0xff]  ;;  %v575_v20 = vld [vmem:[%s2003_s26 + $0x2e8] sm:$0xff]  ;;  %v1421_v22 = vpack.c.bf16 %v508_v14, %v506_v13 }
  0x70   : > { %v577_v21 = vld [vmem:[%s2003_s26 + $0x2f8] sm:$0xff]  ;;  %v1485_v23 = vpack.c.bf16 %v572_v17, %v570_v15  ;;  %v1423_v24 = vpack.c.bf16 %v513_v19, %v511_v18  ;;  %v510_v25 = vld [vmem:[%s2003_s26 + $0xe0] sm:$0xff]  ;;  %v512_v26 = vld [vmem:[%s2003_s26 + $0xf0] sm:$0xff] }
  0x71   : > { %1414 = vmatpush1.bf16.msra.mxu1 %v1413_v62  ;;  %v574_v27 = vld [vmem:[%s2003_s26 + $0x2e0] sm:$0xff]  ;;  %v1487_v28 = vpack.c.bf16 %v577_v21, %v575_v20  ;;  %v576_v29 = vld [vmem:[%s2003_s26 + $0x2f0] sm:$0xff]  ;;  %v515_v30 = vld [vmem:[%s2003_s26 + $0x108] sm:$0xff]  ;;  %v1425_v34 = vpack.c.bf16 %v512_v26, %v510_v25 }
  0x72   : > { %1478 = vmatpush1.bf16.msra.mxu0 %v1477_v63  ;;  %1416 = vmatprep.subr.bf16.mxu1 %v1415_v0  ;;  %v517_v31 = vld [vmem:[%s2003_s26 + $0x118] sm:$0xff]  ;;  %v579_v32 = vld [vmem:[%s2003_s26 + $0x308] sm:$0xff]  ;;  %v1489_v35 = vpack.c.bf16 %v576_v29, %v574_v27  ;;  %v514_v37 = vld [vmem:[%s2003_s26 + $0x100] sm:$0xff] }
  0x73   : > { %1480 = vmatprep.subr.bf16.mxu0 %v1479_v4  ;;  %v581_v33 = vld [vmem:[%s2003_s26 + $0x318] sm:$0xff]  ;;  %v1427_v36 = vpack.c.bf16 %v517_v31, %v515_v30  ;;  %v516_v38 = vld [vmem:[%s2003_s26 + $0x110] sm:$0xff]  ;;  %v578_v39 = vld [vmem:[%s2003_s26 + $0x300] sm:$0xff] }
  0x74   : > { %v1491_v40 = vpack.c.bf16 %v581_v33, %v579_v32  ;;  %v580_v41 = vld [vmem:[%s2003_s26 + $0x310] sm:$0xff]  ;;  %v519_v42 = vld [vmem:[%s2003_s26 + $0x128] sm:$0xff]  ;;  %v521_v43 = vld [vmem:[%s2003_s26 + $0x138] sm:$0xff]  ;;  %v1429_v46 = vpack.c.bf16 %v516_v38, %v514_v37 }
  0x75   : > { %1418 = vmatpush1.bf16.msra.mxu1 %v1417_v10  ;;  %v583_v44 = vld [vmem:[%s2003_s26 + $0x328] sm:$0xff]  ;;  %v585_v45 = vld [vmem:[%s2003_s26 + $0x338] sm:$0xff]  ;;  %v1493_v47 = vpack.c.bf16 %v580_v41, %v578_v39  ;;  %v1431_v48 = vpack.c.bf16 %v521_v43, %v519_v42  ;;  %v518_v49 = vld [vmem:[%s2003_s26 + $0x120] sm:$0xff] }
  0x76   : > { %1482 = vmatpush1.bf16.msra.mxu0 %v1481_v11  ;;  %1420 = vmatprep.subr.bf16.mxu1 %v1419_v12  ;;  %v520_v50 = vld [vmem:[%s2003_s26 + $0x130] sm:$0xff]  ;;  %v582_v51 = vld [vmem:[%s2003_s26 + $0x320] sm:$0xff]  ;;  %v1495_v52 = vpack.c.bf16 %v585_v45, %v583_v44  ;;  %v523_v54 = vld [vmem:[%s2003_s26 + $0x148] sm:$0xff] }
  0x77   : > { %1484 = vmatprep.subr.bf16.mxu0 %v1483_v16  ;;  %v584_v53 = vld [vmem:[%s2003_s26 + $0x330] sm:$0xff]  ;;  %v525_v55 = vld [vmem:[%s2003_s26 + $0x158] sm:$0xff]  ;;  %v587_v56 = vld [vmem:[%s2003_s26 + $0x348] sm:$0xff]  ;;  %v1433_v58 = vpack.c.bf16 %v520_v50, %v518_v49 }
  0x78   : > { %v589_v57 = vld [vmem:[%s2003_s26 + $0x358] sm:$0xff]  ;;  %v1497_v59 = vpack.c.bf16 %v584_v53, %v582_v51  ;;  %v1435_v60 = vpack.c.bf16 %v525_v55, %v523_v54  ;;  %v522_v61 = vld [vmem:[%s2003_s26 + $0x140] sm:$0xff]  ;;  %v524_v62 = vld [vmem:[%s2003_s26 + $0x150] sm:$0xff] }
  0x79   : > { %1422 = vmatpush1.bf16.msra.mxu1 %v1421_v22  ;;  %v586_v63 = vld [vmem:[%s2003_s26 + $0x340] sm:$0xff]  ;;  %v1499_v0 = vpack.c.bf16 %v589_v57, %v587_v56  ;;  %v588_v1 = vld [vmem:[%s2003_s26 + $0x350] sm:$0xff]  ;;  %v527_v2 = vld [vmem:[%s2003_s26 + $0x168] sm:$0xff]  ;;  %v1437_v6 = vpack.c.bf16 %v524_v62, %v522_v61 }
  0x7a   : > { %1486 = vmatpush1.bf16.msra.mxu0 %v1485_v23  ;;  %1424 = vmatprep.subr.bf16.mxu1 %v1423_v24  ;;  %v529_v3 = vld [vmem:[%s2003_s26 + $0x178] sm:$0xff]  ;;  %v591_v4 = vld [vmem:[%s2003_s26 + $0x368] sm:$0xff]  ;;  %v526_v7 = vld [vmem:[%s2003_s26 + $0x160] sm:$0xff]  ;;  %v1501_v8 = vpack.c.bf16 %v588_v1, %v586_v63 }
  0x7b   : > { %1488 = vmatprep.subr.bf16.mxu0 %v1487_v28  ;;  %v593_v5 = vld [vmem:[%s2003_s26 + $0x378] sm:$0xff]  ;;  %v1439_v9 = vpack.c.bf16 %v529_v3, %v527_v2  ;;  %v528_v10 = vld [vmem:[%s2003_s26 + $0x170] sm:$0xff]  ;;  %v590_v11 = vld [vmem:[%s2003_s26 + $0x360] sm:$0xff] }
  0x7c   : > { %v592_v12 = vld [vmem:[%s2003_s26 + $0x370] sm:$0xff]  ;;  %v1503_v13 = vpack.c.bf16 %v593_v5, %v591_v4  ;;  %v531_v14 = vld [vmem:[%s2003_s26 + $0x188] sm:$0xff]  ;;  %v533_v15 = vld [vmem:[%s2003_s26 + $0x198] sm:$0xff]  ;;  %v1441_v20 = vpack.c.bf16 %v528_v10, %v526_v7 }
  0x7d   : > { %1426 = vmatpush1.bf16.msra.mxu1 %v1425_v34  ;;  %v355_v16 = vld [vmem:[#allocation2 + $0x8] sm:$0xff]  ;;  %v597_v18 = vld [vmem:[%s2003_s26 + $0x398] sm:$0xff]  ;;  %v1505_v21 = vpack.c.bf16 %v592_v12, %v590_v11  ;;  %v1443_v22 = vpack.c.bf16 %v533_v15, %v531_v14  ;;  %v530_v23 = vld [vmem:[%s2003_s26 + $0x180] sm:$0xff] }
  0x7e   : > { %1490 = vmatpush1.bf16.msra.mxu0 %v1489_v35  ;;  %1428 = vmatprep.subr.bf16.mxu1 %v1427_v36  ;;  %v595_v17 = vld [vmem:[%s2003_s26 + $0x388] sm:$0xff]  ;;  %v357_v19 = vld [vmem:[#allocation2 + $0x18] sm:$0xff]  ;;  %v532_v24 = vld [vmem:[%s2003_s26 + $0x190] sm:$0xff] }
  0x7f   : > { %1492 = vmatprep.subr.bf16.mxu0 %v1491_v40  ;;  %674 = vmatprep.mubr.f32.mxu1 %v355_v16  ;;  %v594_v25 = vld [vmem:[%s2003_s26 + $0x380] sm:$0xff]  ;;  %v1507_v26 = vpack.c.bf16 %v597_v18, %v595_v17  ;;  %v596_v27 = vld [vmem:[%s2003_s26 + $0x390] sm:$0xff]  ;;  %v535_v28 = vld [vmem:[%s2003_s26 + $0x1a8] sm:$0xff]  ;;  %v1445_v32 = vpack.c.bf16 %v532_v24, %v530_v23 }
  0x80   : > { %931 = vmatprep.mubr.f32.mxu0 %v357_v19  ;;  %v537_v29 = vld [vmem:[%s2003_s26 + $0x1b8] sm:$0xff]  ;;  %v599_v30 = vld [vmem:[%s2003_s26 + $0x3a8] sm:$0xff]  ;;  %v1509_v33 = vpack.c.bf16 %v596_v27, %v594_v25  ;;  %v534_v35 = vld [vmem:[%s2003_s26 + $0x1a0] sm:$0xff] }
  0x81   : > { %1430 = vmatpush1.bf16.msra.mxu1 %v1429_v46  ;;  %v601_v31 = vld [vmem:[%s2003_s26 + $0x3b8] sm:$0xff]  ;;  %v1447_v34 = vpack.c.bf16 %v537_v29, %v535_v28  ;;  %v536_v36 = vld [vmem:[%s2003_s26 + $0x1b0] sm:$0xff]  ;;  %v598_v37 = vld [vmem:[%s2003_s26 + $0x3a0] sm:$0xff] }
  0x82   : > { %1494 = vmatpush1.bf16.msra.mxu0 %v1493_v47  ;;  %1432 = vmatprep.subr.bf16.mxu1 %v1431_v48  ;;  %v1511_v38 = vpack.c.bf16 %v601_v31, %v599_v30  ;;  %v600_v39 = vld [vmem:[%s2003_s26 + $0x3b0] sm:$0xff]  ;;  %v539_v40 = vld [vmem:[%s2003_s26 + $0x1c8] sm:$0xff]  ;;  %v541_v41 = vld [vmem:[%s2003_s26 + $0x1d8] sm:$0xff]  ;;  %v1449_v44 = vpack.c.bf16 %v536_v36, %v534_v35 }
  0x83   : > { %1496 = vmatprep.subr.bf16.mxu0 %v1495_v52  ;;  %v603_v42 = vld [vmem:[%s2003_s26 + $0x3c8] sm:$0xff]  ;;  %v605_v43 = vld [vmem:[%s2003_s26 + $0x3d8] sm:$0xff]  ;;  %v1513_v45 = vpack.c.bf16 %v600_v39, %v598_v37  ;;  %v1451_v46 = vpack.c.bf16 %v541_v41, %v539_v40  ;;  %v538_v47 = vld [vmem:[%s2003_s26 + $0x1c0] sm:$0xff] }
  0x84   : > { %v540_v48 = vld [vmem:[%s2003_s26 + $0x1d0] sm:$0xff]  ;;  %v602_v49 = vld [vmem:[%s2003_s26 + $0x3c0] sm:$0xff]  ;;  %v1515_v50 = vpack.c.bf16 %v605_v43, %v603_v42  ;;  %v543_v52 = vld [vmem:[%s2003_s26 + $0x1e8] sm:$0xff] }
  0x85   : > { %1434 = vmatpush1.bf16.msra.mxu1 %v1433_v58  ;;  %v604_v51 = vld [vmem:[%s2003_s26 + $0x3d0] sm:$0xff]  ;;  %v545_v53 = vld [vmem:[%s2003_s26 + $0x1f8] sm:$0xff]  ;;  %v607_v54 = vld [vmem:[%s2003_s26 + $0x3e8] sm:$0xff]  ;;  %v1453_v56 = vpack.c.bf16 %v540_v48, %v538_v47 }
  0x86   : > { %1498 = vmatpush1.bf16.msra.mxu0 %v1497_v59  ;;  %1436 = vmatprep.subr.bf16.mxu1 %v1435_v60  ;;  %v609_v55 = vld [vmem:[%s2003_s26 + $0x3f8] sm:$0xff]  ;;  %v1517_v57 = vpack.c.bf16 %v604_v51, %v602_v49  ;;  %v1455_v58 = vpack.c.bf16 %v545_v53, %v543_v52  ;;  %v542_v59 = vld [vmem:[%s2003_s26 + $0x1e0] sm:$0xff]  ;;  %v544_v60 = vld [vmem:[%s2003_s26 + $0x1f0] sm:$0xff] }
  0x87   : > { %1500 = vmatprep.subr.bf16.mxu0 %v1499_v0  ;;  %v1519_v61 = vpack.c.bf16 %v609_v55, %v607_v54  ;;  %v606_v62 = vld [vmem:[%s2003_s26 + $0x3e0] sm:$0xff]  ;;  %v608_v63 = vld [vmem:[%s2003_s26 + $0x3f0] sm:$0xff]  ;;  %v1457_v0 = vpack.c.bf16 %v544_v60, %v542_v59  ;;  %v359_v4 = vld [vmem:[#allocation2 + $0x28] sm:$0xff] }
  0x88   : > { %v1521_v1 = vpack.c.bf16 %v608_v63, %v606_v62  ;;  %v354_v2 = vld [vmem:[#allocation2] sm:$0xff]  ;;  %v356_v3 = vld [vmem:[#allocation2 + $0x10] sm:$0xff]  ;;  %v361_v5 = vld [vmem:[#allocation2 + $0x38] sm:$0xff] }
  0x89   : > { %1438 = vmatpush1.bf16.msra.mxu1 %v1437_v6  ;;  %v358_v6 = vld [vmem:[#allocation2 + $0x20] sm:$0xff]  ;;  %v360_v7 = vld [vmem:[#allocation2 + $0x30] sm:$0xff]  ;;  %v367_v12 = vld [vmem:[#allocation2 + $0x68] sm:$0xff] }
  0x8a   : > { %1502 = vmatpush1.bf16.msra.mxu0 %v1501_v8  ;;  %1440 = vmatprep.subr.bf16.mxu1 %v1439_v9  ;;  %v363_v8 = vld [vmem:[#allocation2 + $0x48] sm:$0xff]  ;;  %v365_v9 = vld [vmem:[#allocation2 + $0x58] sm:$0xff]  ;;  %v362_v10 = vld [vmem:[#allocation2 + $0x40] sm:$0xff] }
  0x8b   : > { %1504 = vmatprep.subr.bf16.mxu0 %v1503_v13  ;;  %v364_v11 = vld [vmem:[#allocation2 + $0x50] sm:$0xff]  ;;  %v369_v13 = vld [vmem:[#allocation2 + $0x78] sm:$0xff]  ;;  %v366_v14 = vld [vmem:[#allocation2 + $0x60] sm:$0xff] }
  0x8c   : > { %v368_v15 = vld [vmem:[#allocation2 + $0x70] sm:$0xff]  ;;  %v371_v16 = vld [vmem:[#allocation2 + $0x88] sm:$0xff]  ;;  %v373_v17 = vld [vmem:[#allocation2 + $0x98] sm:$0xff] }
  0x8d   : > { %1442 = vmatpush1.bf16.msra.mxu1 %v1441_v20  ;;  %v370_v18 = vld [vmem:[#allocation2 + $0x80] sm:$0xff]  ;;  %v372_v19 = vld [vmem:[#allocation2 + $0x90] sm:$0xff]  ;;  %v375_v20 = vld [vmem:[#allocation2 + $0xa8] sm:$0xff] }
  0x8e   : > { %1506 = vmatpush1.bf16.msra.mxu0 %v1505_v21  ;;  %1444 = vmatprep.subr.bf16.mxu1 %v1443_v22  ;;  %v377_v21 = vld [vmem:[#allocation2 + $0xb8] sm:$0xff]  ;;  %v374_v22 = vld [vmem:[#allocation2 + $0xa0] sm:$0xff]  ;;  %v376_v23 = vld [vmem:[#allocation2 + $0xb0] sm:$0xff] }
  0x8f   : > { %1508 = vmatprep.subr.bf16.mxu0 %v1507_v26  ;;  %v379_v24 = vld [vmem:[#allocation2 + $0xc8] sm:$0xff]  ;;  %v381_v25 = vld [vmem:[#allocation2 + $0xd8] sm:$0xff]  ;;  %v378_v26 = vld [vmem:[#allocation2 + $0xc0] sm:$0xff] }
  0x90   : > { %v380_v27 = vld [vmem:[#allocation2 + $0xd0] sm:$0xff]  ;;  %v383_v28 = vld [vmem:[#allocation2 + $0xe8] sm:$0xff]  ;;  %v385_v29 = vld [vmem:[#allocation2 + $0xf8] sm:$0xff] }
  0x91   : > { %1446 = vmatpush1.bf16.msra.mxu1 %v1445_v32  ;;  %v382_v30 = vld [vmem:[#allocation2 + $0xe0] sm:$0xff]  ;;  %v384_v31 = vld [vmem:[#allocation2 + $0xf0] sm:$0xff]  ;;  %v387_v32 = vld [vmem:[#allocation2 + $0x108] sm:$0xff] }
  0x92   : > { %1510 = vmatpush1.bf16.msra.mxu0 %v1509_v33  ;;  %1448 = vmatprep.subr.bf16.mxu1 %v1447_v34  ;;  %v389_v33 = vld [vmem:[#allocation2 + $0x118] sm:$0xff]  ;;  %v386_v34 = vld [vmem:[#allocation2 + $0x100] sm:$0xff]  ;;  %v388_v35 = vld [vmem:[#allocation2 + $0x110] sm:$0xff] }
  0x93   : > { %1512 = vmatprep.subr.bf16.mxu0 %v1511_v38  ;;  %v391_v36 = vld [vmem:[#allocation2 + $0x128] sm:$0xff]  ;;  %v393_v37 = vld [vmem:[#allocation2 + $0x138] sm:$0xff]  ;;  %v390_v38 = vld [vmem:[#allocation2 + $0x120] sm:$0xff] }
  0x94   : > { %v392_v39 = vld [vmem:[#allocation2 + $0x130] sm:$0xff]  ;;  %v395_v40 = vld [vmem:[#allocation2 + $0x148] sm:$0xff]  ;;  %v397_v41 = vld [vmem:[#allocation2 + $0x158] sm:$0xff] }
  0x95   : > { %1450 = vmatpush1.bf16.msra.mxu1 %v1449_v44  ;;  %v394_v42 = vld [vmem:[#allocation2 + $0x140] sm:$0xff]  ;;  %v396_v43 = vld [vmem:[#allocation2 + $0x150] sm:$0xff]  ;;  %v399_v44 = vld [vmem:[#allocation2 + $0x168] sm:$0xff] }
  0x96   : > { %1514 = vmatpush1.bf16.msra.mxu0 %v1513_v45  ;;  %1452 = vmatprep.subr.bf16.mxu1 %v1451_v46  ;;  %v401_v45 = vld [vmem:[#allocation2 + $0x178] sm:$0xff]  ;;  %v398_v46 = vld [vmem:[#allocation2 + $0x160] sm:$0xff]  ;;  %v400_v47 = vld [vmem:[#allocation2 + $0x170] sm:$0xff] }
  0x97   : > { %1516 = vmatprep.subr.bf16.mxu0 %v1515_v50  ;;  %v403_v48 = vld [vmem:[#allocation2 + $0x188] sm:$0xff]  ;;  %v405_v49 = vld [vmem:[#allocation2 + $0x198] sm:$0xff]  ;;  %v402_v50 = vld [vmem:[#allocation2 + $0x180] sm:$0xff] }
  0x98   : > { %v404_v51 = vld [vmem:[#allocation2 + $0x190] sm:$0xff]  ;;  %v407_v52 = vld [vmem:[#allocation2 + $0x1a8] sm:$0xff]  ;;  %v409_v53 = vld [vmem:[#allocation2 + $0x1b8] sm:$0xff] }
  0x99   : > { %1454 = vmatpush1.bf16.msra.mxu1 %v1453_v56  ;;  %v406_v54 = vld [vmem:[#allocation2 + $0x1a0] sm:$0xff]  ;;  %v408_v55 = vld [vmem:[#allocation2 + $0x1b0] sm:$0xff]  ;;  %v411_v56 = vld [vmem:[#allocation2 + $0x1c8] sm:$0xff] }
  0x9a   : > { %1518 = vmatpush1.bf16.msra.mxu0 %v1517_v57  ;;  %1456 = vmatprep.subr.bf16.mxu1 %v1455_v58  ;;  %v413_v57 = vld [vmem:[#allocation2 + $0x1d8] sm:$0xff]  ;;  %v410_v58 = vld [vmem:[#allocation2 + $0x1c0] sm:$0xff]  ;;  %v412_v59 = vld [vmem:[#allocation2 + $0x1d0] sm:$0xff] }
  0x9b   : > { %1520 = vmatprep.subr.bf16.mxu0 %v1519_v61  ;;  %v415_v60 = vld [vmem:[#allocation2 + $0x1e8] sm:$0xff]  ;;  %v417_v61 = vld [vmem:[#allocation2 + $0x1f8] sm:$0xff]  ;;  %v414_v62 = vld [vmem:[#allocation2 + $0x1e0] sm:$0xff] }
  0x9c   : > { %v416_v63 = vld [vmem:[#allocation2 + $0x1f0] sm:$0xff] }
  0x9d   : > { %1458 = vmatpush1.bf16.msra.mxu1 %v1457_v0  ;;  %v419_v0 = vld [vmem:[#allocation2 + $0x208] sm:$0xff] }
  0x9e   : > { %1522 = vmatpush1.bf16.msra.mxu0 %v1521_v1  ;;  %v421_v1 = vld [vmem:[#allocation2 + $0x218] sm:$0xff] }
  0xa0   : > { %675 = vmatmul.mubr.f32.vlgmr.msra.gmra.mrb[0].mxu1 %v354_v2  ;;  %v418_v2 = vld [vmem:[#allocation2 + $0x200] sm:$0xff] }
  0xa1   : > { %932 = vmatmul.mubr.f32.vlgmr.msra.gmra.mrb[0].mxu0 %v356_v3  ;;  %680 = vmatprep.mubr.f32.mxu1 %v359_v4  ;;  %v420_v3 = vld [vmem:[#allocation2 + $0x210] sm:$0xff]  ;;  %v423_v4 = vld [vmem:[#allocation2 + $0x228] sm:$0xff] }
  0xa2   : > { %937 = vmatprep.mubr.f32.mxu0 %v361_v5  ;;  %v425_v5 = vld [vmem:[#allocation2 + $0x238] sm:$0xff] }
  0xa4   : > { %681 = vmatmul.mubr.f32.gmra.mrb[2].mxu1 %v358_v6  ;;  %v422_v6 = vld [vmem:[#allocation2 + $0x220] sm:$0xff] }
  0xa5   : > { %938 = vmatmul.mubr.f32.gmra.mrb[2].mxu0 %v360_v7  ;;  %686 = vmatprep.mubr.f32.mxu1 %v363_v8  ;;  %v424_v7 = vld [vmem:[#allocation2 + $0x230] sm:$0xff]  ;;  %v427_v8 = vld [vmem:[#allocation2 + $0x248] sm:$0xff] }
  0xa6   : > { %943 = vmatprep.mubr.f32.mxu0 %v365_v9  ;;  %v429_v9 = vld [vmem:[#allocation2 + $0x258] sm:$0xff] }
  0xa8   : > { %687 = vmatmul.mubr.f32.gmra.mrb[4].mxu1 %v362_v10  ;;  %v426_v10 = vld [vmem:[#allocation2 + $0x240] sm:$0xff] }
  0xa9   : > { %944 = vmatmul.mubr.f32.gmra.mrb[4].mxu0 %v364_v11  ;;  %692 = vmatprep.mubr.f32.mxu1 %v367_v12  ;;  %v428_v11 = vld [vmem:[#allocation2 + $0x250] sm:$0xff]  ;;  %v431_v12 = vld [vmem:[#allocation2 + $0x268] sm:$0xff] }
  0xaa   : > { %949 = vmatprep.mubr.f32.mxu0 %v369_v13  ;;  %v433_v13 = vld [vmem:[#allocation2 + $0x278] sm:$0xff] }
  0xac   : > { %693 = vmatmul.mubr.f32.gmra.mrb[6].mxu1 %v366_v14  ;;  %v430_v14 = vld [vmem:[#allocation2 + $0x260] sm:$0xff] }
  0xad   : > { %950 = vmatmul.mubr.f32.gmra.mrb[6].mxu0 %v368_v15  ;;  %698 = vmatprep.mubr.f32.mxu1 %v371_v16  ;;  %v432_v15 = vld [vmem:[#allocation2 + $0x270] sm:$0xff]  ;;  %v435_v16 = vld [vmem:[#allocation2 + $0x288] sm:$0xff] }
  0xae   : > { %955 = vmatprep.mubr.f32.mxu0 %v373_v17  ;;  %v437_v17 = vld [vmem:[#allocation2 + $0x298] sm:$0xff] }
  0xb0   : > { %699 = vmatmul.mubr.f32.gmra.mrb[8].mxu1 %v370_v18  ;;  %v434_v18 = vld [vmem:[#allocation2 + $0x280] sm:$0xff] }
  0xb1   : > { %956 = vmatmul.mubr.f32.gmra.mrb[8].mxu0 %v372_v19  ;;  %704 = vmatprep.mubr.f32.mxu1 %v375_v20  ;;  %v436_v19 = vld [vmem:[#allocation2 + $0x290] sm:$0xff]  ;;  %v439_v20 = vld [vmem:[#allocation2 + $0x2a8] sm:$0xff] }
  0xb2   : > { %961 = vmatprep.mubr.f32.mxu0 %v377_v21  ;;  %v441_v21 = vld [vmem:[#allocation2 + $0x2b8] sm:$0xff] }
  0xb4   : > { %705 = vmatmul.mubr.f32.gmra.mrb[10].mxu1 %v374_v22  ;;  %v438_v22 = vld [vmem:[#allocation2 + $0x2a0] sm:$0xff] }
  0xb5   : > { %962 = vmatmul.mubr.f32.gmra.mrb[10].mxu0 %v376_v23  ;;  %710 = vmatprep.mubr.f32.mxu1 %v379_v24  ;;  %v440_v23 = vld [vmem:[#allocation2 + $0x2b0] sm:$0xff]  ;;  %v443_v24 = vld [vmem:[#allocation2 + $0x2c8] sm:$0xff] }
  0xb6   : > { %967 = vmatprep.mubr.f32.mxu0 %v381_v25  ;;  %v445_v25 = vld [vmem:[#allocation2 + $0x2d8] sm:$0xff] }
  0xb8   : > { %711 = vmatmul.mubr.f32.gmra.mrb[12].mxu1 %v378_v26  ;;  %v442_v26 = vld [vmem:[#allocation2 + $0x2c0] sm:$0xff] }
  0xb9   : > { %968 = vmatmul.mubr.f32.gmra.mrb[12].mxu0 %v380_v27  ;;  %716 = vmatprep.mubr.f32.mxu1 %v383_v28  ;;  %v444_v27 = vld [vmem:[#allocation2 + $0x2d0] sm:$0xff]  ;;  %v447_v28 = vld [vmem:[#allocation2 + $0x2e8] sm:$0xff] }
  0xba   : > { %973 = vmatprep.mubr.f32.mxu0 %v385_v29  ;;  %v449_v29 = vld [vmem:[#allocation2 + $0x2f8] sm:$0xff] }
  0xbc   : > { %717 = vmatmul.mubr.f32.gmra.mrb[14].mxu1 %v382_v30  ;;  %v446_v30 = vld [vmem:[#allocation2 + $0x2e0] sm:$0xff] }
  0xbd   : > { %974 = vmatmul.mubr.f32.gmra.mrb[14].mxu0 %v384_v31  ;;  %722 = vmatprep.mubr.f32.mxu1 %v387_v32  ;;  %v448_v31 = vld [vmem:[#allocation2 + $0x2f0] sm:$0xff]  ;;  %v451_v32 = vld [vmem:[#allocation2 + $0x308] sm:$0xff] }
  0xbe   : > { %979 = vmatprep.mubr.f32.mxu0 %v389_v33  ;;  %v453_v33 = vld [vmem:[#allocation2 + $0x318] sm:$0xff] }
  0xc0   : > { %723 = vmatmul.mubr.f32.gmra.mrb[16].mxu1 %v386_v34  ;;  %v450_v34 = vld [vmem:[#allocation2 + $0x300] sm:$0xff] }
  0xc1   : > { %980 = vmatmul.mubr.f32.gmra.mrb[16].mxu0 %v388_v35  ;;  %728 = vmatprep.mubr.f32.mxu1 %v391_v36  ;;  %v452_v35 = vld [vmem:[#allocation2 + $0x310] sm:$0xff]  ;;  %v455_v36 = vld [vmem:[#allocation2 + $0x328] sm:$0xff] }
  0xc2   : > { %985 = vmatprep.mubr.f32.mxu0 %v393_v37  ;;  %v457_v37 = vld [vmem:[#allocation2 + $0x338] sm:$0xff] }
  0xc4   : > { %729 = vmatmul.mubr.f32.gmra.mrb[18].mxu1 %v390_v38  ;;  %v454_v38 = vld [vmem:[#allocation2 + $0x320] sm:$0xff] }
  0xc5   : > { %986 = vmatmul.mubr.f32.gmra.mrb[18].mxu0 %v392_v39  ;;  %734 = vmatprep.mubr.f32.mxu1 %v395_v40  ;;  %v456_v39 = vld [vmem:[#allocation2 + $0x330] sm:$0xff]  ;;  %v459_v40 = vld [vmem:[#allocation2 + $0x348] sm:$0xff] }
  0xc6   : > { %991 = vmatprep.mubr.f32.mxu0 %v397_v41  ;;  %v461_v41 = vld [vmem:[#allocation2 + $0x358] sm:$0xff] }
  0xc8   : > { %735 = vmatmul.mubr.f32.gmra.mrb[20].mxu1 %v394_v42  ;;  %v458_v42 = vld [vmem:[#allocation2 + $0x340] sm:$0xff] }
  0xc9   : > { %992 = vmatmul.mubr.f32.gmra.mrb[20].mxu0 %v396_v43  ;;  %740 = vmatprep.mubr.f32.mxu1 %v399_v44  ;;  %v460_v43 = vld [vmem:[#allocation2 + $0x350] sm:$0xff]  ;;  %v463_v44 = vld [vmem:[#allocation2 + $0x368] sm:$0xff] }
  0xca   : > { %997 = vmatprep.mubr.f32.mxu0 %v401_v45  ;;  %v465_v45 = vld [vmem:[#allocation2 + $0x378] sm:$0xff] }
  0xcc   : > { %741 = vmatmul.mubr.f32.gmra.mrb[22].mxu1 %v398_v46  ;;  %v462_v46 = vld [vmem:[#allocation2 + $0x360] sm:$0xff] }
  0xcd   : > { %998 = vmatmul.mubr.f32.gmra.mrb[22].mxu0 %v400_v47  ;;  %746 = vmatprep.mubr.f32.mxu1 %v403_v48  ;;  %v464_v47 = vld [vmem:[#allocation2 + $0x370] sm:$0xff]  ;;  %v467_v48 = vld [vmem:[#allocation2 + $0x388] sm:$0xff] }
  0xce   : > { %1003 = vmatprep.mubr.f32.mxu0 %v405_v49  ;;  %v469_v49 = vld [vmem:[#allocation2 + $0x398] sm:$0xff] }
  0xd0   : > { %747 = vmatmul.mubr.f32.gmra.mrb[24].mxu1 %v402_v50  ;;  %v466_v50 = vld [vmem:[#allocation2 + $0x380] sm:$0xff] }
  0xd1   : > { %1004 = vmatmul.mubr.f32.gmra.mrb[24].mxu0 %v404_v51  ;;  %752 = vmatprep.mubr.f32.mxu1 %v407_v52  ;;  %v468_v51 = vld [vmem:[#allocation2 + $0x390] sm:$0xff]  ;;  %v471_v52 = vld [vmem:[#allocation2 + $0x3a8] sm:$0xff] }
  0xd2   : > { %1009 = vmatprep.mubr.f32.mxu0 %v409_v53  ;;  %v473_v53 = vld [vmem:[#allocation2 + $0x3b8] sm:$0xff] }
  0xd4   : > { %753 = vmatmul.mubr.f32.gmra.mrb[26].mxu1 %v406_v54  ;;  %v470_v54 = vld [vmem:[#allocation2 + $0x3a0] sm:$0xff] }
  0xd5   : > { %1010 = vmatmul.mubr.f32.gmra.mrb[26].mxu0 %v408_v55  ;;  %758 = vmatprep.mubr.f32.mxu1 %v411_v56  ;;  %v472_v55 = vld [vmem:[#allocation2 + $0x3b0] sm:$0xff]  ;;  %v475_v56 = vld [vmem:[#allocation2 + $0x3c8] sm:$0xff] }
  0xd6   : > { %1015 = vmatprep.mubr.f32.mxu0 %v413_v57  ;;  %v477_v57 = vld [vmem:[#allocation2 + $0x3d8] sm:$0xff] }
  0xd8   : > { %759 = vmatmul.mubr.f32.gmra.mrb[28].mxu1 %v410_v58  ;;  %v474_v58 = vld [vmem:[#allocation2 + $0x3c0] sm:$0xff] }
  0xd9   : > { %1016 = vmatmul.mubr.f32.gmra.mrb[28].mxu0 %v412_v59  ;;  %764 = vmatprep.mubr.f32.mxu1 %v415_v60  ;;  %v476_v59 = vld [vmem:[#allocation2 + $0x3d0] sm:$0xff]  ;;  %v479_v60 = vld [vmem:[#allocation2 + $0x3e8] sm:$0xff] }
  0xda   : > { %1021 = vmatprep.mubr.f32.mxu0 %v417_v61  ;;  %v481_v61 = vld [vmem:[#allocation2 + $0x3f8] sm:$0xff] }
  0xdc   : > { %765 = vmatmul.mubr.f32.gmra.mrb[30].mxu1 %v414_v62  ;;  %v478_v62 = vld [vmem:[#allocation2 + $0x3e0] sm:$0xff] }
  0xdd   : > { %1022 = vmatmul.mubr.f32.gmra.mrb[30].mxu0 %v416_v63  ;;  %770 = vmatprep.mubr.f32.mxu1 %v419_v0  ;;  %v480_v63 = vld [vmem:[#allocation2 + $0x3f0] sm:$0xff] }
  0xde   : > { %1027 = vmatprep.mubr.f32.mxu0 %v421_v1 }
  0xe0   : > { %771 = vmatmul.mubr.f32.gmra.mrb[32].mxu1 %v418_v2 }
  0xe1   : > { %1028 = vmatmul.mubr.f32.gmra.mrb[32].mxu0 %v420_v3  ;;  %776 = vmatprep.mubr.f32.mxu1 %v423_v4 }
  0xe2   : > { %1033 = vmatprep.mubr.f32.mxu0 %v425_v5 }
  0xe4   : > { %777 = vmatmul.mubr.f32.gmra.mrb[34].mxu1 %v422_v6 }
  0xe5   : > { %1034 = vmatmul.mubr.f32.gmra.mrb[34].mxu0 %v424_v7  ;;  %782 = vmatprep.mubr.f32.mxu1 %v427_v8 }
  0xe6   : > { %1039 = vmatprep.mubr.f32.mxu0 %v429_v9 }
  0xe8   : > { %783 = vmatmul.mubr.f32.gmra.mrb[36].mxu1 %v426_v10 }
  0xe9   : > { %1040 = vmatmul.mubr.f32.gmra.mrb[36].mxu0 %v428_v11  ;;  %788 = vmatprep.mubr.f32.mxu1 %v431_v12 }
  0xea   : > { %1045 = vmatprep.mubr.f32.mxu0 %v433_v13 }
  0xec   : > { %789 = vmatmul.mubr.f32.gmra.mrb[38].mxu1 %v430_v14 }
  0xed   : > { %1046 = vmatmul.mubr.f32.gmra.mrb[38].mxu0 %v432_v15  ;;  %794 = vmatprep.mubr.f32.mxu1 %v435_v16 }
  0xee   : > { %1051 = vmatprep.mubr.f32.mxu0 %v437_v17 }
  0xf0   : > { %795 = vmatmul.mubr.f32.gmra.mrb[40].mxu1 %v434_v18 }
  0xf1   : > { %1052 = vmatmul.mubr.f32.gmra.mrb[40].mxu0 %v436_v19  ;;  %800 = vmatprep.mubr.f32.mxu1 %v439_v20 }
  0xf2   : > { %1057 = vmatprep.mubr.f32.mxu0 %v441_v21 }
  0xf4   : > { %801 = vmatmul.mubr.f32.gmra.mrb[42].mxu1 %v438_v22 }
  0xf5   : > { %1058 = vmatmul.mubr.f32.gmra.mrb[42].mxu0 %v440_v23  ;;  %806 = vmatprep.mubr.f32.mxu1 %v443_v24 }
  0xf6   : > { %1063 = vmatprep.mubr.f32.mxu0 %v445_v25 }
  0xf8   : > { %807 = vmatmul.mubr.f32.gmra.mrb[44].mxu1 %v442_v26 }
  0xf9   : > { %1064 = vmatmul.mubr.f32.gmra.mrb[44].mxu0 %v444_v27  ;;  %812 = vmatprep.mubr.f32.mxu1 %v447_v28 }
  0xfa   : > { %1069 = vmatprep.mubr.f32.mxu0 %v449_v29 }
  0xfc   : > { %813 = vmatmul.mubr.f32.gmra.mrb[46].mxu1 %v446_v30 }
  0xfd   : > { %1070 = vmatmul.mubr.f32.gmra.mrb[46].mxu0 %v448_v31  ;;  %818 = vmatprep.mubr.f32.mxu1 %v451_v32 }
  0xfe   : > { %1075 = vmatprep.mubr.f32.mxu0 %v453_v33 }
 0x100   : > { %819 = vmatmul.mubr.f32.gmra.mrb[48].mxu1 %v450_v34 }
 0x101   : > { %1076 = vmatmul.mubr.f32.gmra.mrb[48].mxu0 %v452_v35  ;;  %824 = vmatprep.mubr.f32.mxu1 %v455_v36 }
 0x102   : > { %1081 = vmatprep.mubr.f32.mxu0 %v457_v37 }
 0x104   : > { %825 = vmatmul.mubr.f32.gmra.mrb[50].mxu1 %v454_v38 }
 0x105   : > { %1082 = vmatmul.mubr.f32.gmra.mrb[50].mxu0 %v456_v39  ;;  %830 = vmatprep.mubr.f32.mxu1 %v459_v40 }
 0x106   : > { %1087 = vmatprep.mubr.f32.mxu0 %v461_v41 }
 0x108   : > { %831 = vmatmul.mubr.f32.gmra.mrb[52].mxu1 %v458_v42 }
 0x109   : > { %1088 = vmatmul.mubr.f32.gmra.mrb[52].mxu0 %v460_v43  ;;  %836 = vmatprep.mubr.f32.mxu1 %v463_v44 }
 0x10a   : > { %1093 = vmatprep.mubr.f32.mxu0 %v465_v45 }
 0x10c   : > { %837 = vmatmul.mubr.f32.gmra.mrb[54].mxu1 %v462_v46 }
 0x10d   : > { %1094 = vmatmul.mubr.f32.gmra.mrb[54].mxu0 %v464_v47  ;;  %842 = vmatprep.mubr.f32.mxu1 %v467_v48 }
 0x10e   : > { %1099 = vmatprep.mubr.f32.mxu0 %v469_v49 }
 0x110   : > { %843 = vmatmul.mubr.f32.gmra.mrb[56].mxu1 %v466_v50 }
 0x111   : > { %1100 = vmatmul.mubr.f32.gmra.mrb[56].mxu0 %v468_v51  ;;  %848 = vmatprep.mubr.f32.mxu1 %v471_v52 }
 0x112   : > { %1105 = vmatprep.mubr.f32.mxu0 %v473_v53 }
 0x114   : > { %849 = vmatmul.mubr.f32.gmra.mrb[58].mxu1 %v470_v54 }
 0x115   : > { %1106 = vmatmul.mubr.f32.gmra.mrb[58].mxu0 %v472_v55  ;;  %854 = vmatprep.mubr.f32.mxu1 %v475_v56 }
 0x116   : > { %1111 = vmatprep.mubr.f32.mxu0 %v477_v57 }
 0x118   : > { %855 = vmatmul.mubr.f32.gmra.mrb[60].mxu1 %v474_v58 }
 0x119   : > { %1112 = vmatmul.mubr.f32.gmra.mrb[60].mxu0 %v476_v59  ;;  %860 = vmatprep.mubr.f32.mxu1 %v479_v60 }
 0x11a   : > { %1117 = vmatprep.mubr.f32.mxu0 %v481_v61 }
 0x11c   : > { %861 = vmatmul.mubr.f32.gmra.mrb[62].mxu1 %v478_v62 }
 0x11d   : > { %1118 = vmatmul.mubr.f32.gmra.mrb[62].mxu0 %v480_v63 }
 0x173   : > { %v676_v0 = vpop.f32.mrb[0].mxu1 }
 0x174   : > { %v933_v1 = vpop.f32.mrb[0].mxu0  ;;  %v678_v2 = vpop.f32.mrb[1].mxu1 }
 0x175   : > { %v934_v3 = vadd.f32 %v933_v1, %v676_v0  ;;  %v935_v4 = vpop.f32.mrb[1].mxu0 }
 0x176   : > { %v936_v5 = vadd.f32 %v935_v4, %v678_v2 }
 0x177   : > { %v682_v6 = vpop.f32.mrb[2].mxu1  ;;  %1188 = vst [vmem:[%s2138_s19] sm:$0xff] %v934_v3 }
 0x178   : > { %v939_v7 = vpop.f32.mrb[2].mxu0  ;;  %v684_v8 = vpop.f32.mrb[3].mxu1  ;;  %1189 = vst [vmem:[%s2138_s19 + $0x8] sm:$0xff] %v936_v5 }
 0x179   : > { %v940_v9 = vadd.f32 %v939_v7, %v682_v6  ;;  %v941_v10 = vpop.f32.mrb[3].mxu0 }
 0x17a   : > { %v942_v11 = vadd.f32 %v941_v10, %v684_v8 }
 0x17b   : > { %v688_v12 = vpop.f32.mrb[4].mxu1  ;;  %1190 = vst [vmem:[%s2138_s19 + $0x10] sm:$0xff] %v940_v9 }
 0x17c   : > { %v945_v13 = vpop.f32.mrb[4].mxu0  ;;  %v690_v14 = vpop.f32.mrb[5].mxu1  ;;  %1191 = vst [vmem:[%s2138_s19 + $0x18] sm:$0xff] %v942_v11 }
 0x17d   : > { %v946_v15 = vadd.f32 %v945_v13, %v688_v12  ;;  %v947_v16 = vpop.f32.mrb[5].mxu0 }
 0x17e   : > { %v948_v17 = vadd.f32 %v947_v16, %v690_v14 }
 0x17f   : > { %v694_v18 = vpop.f32.mrb[6].mxu1  ;;  %1192 = vst [vmem:[%s2138_s19 + $0x20] sm:$0xff] %v946_v15 }
 0x180   : > { %v951_v19 = vpop.f32.mrb[6].mxu0  ;;  %v696_v20 = vpop.f32.mrb[7].mxu1  ;;  %1193 = vst [vmem:[%s2138_s19 + $0x28] sm:$0xff] %v948_v17 }
 0x181   : > { %v952_v21 = vadd.f32 %v951_v19, %v694_v18  ;;  %v953_v22 = vpop.f32.mrb[7].mxu0 }
 0x182   : > { %v954_v23 = vadd.f32 %v953_v22, %v696_v20 }
 0x183   : > { %v700_v24 = vpop.f32.mrb[8].mxu1  ;;  %1194 = vst [vmem:[%s2138_s19 + $0x30] sm:$0xff] %v952_v21 }
 0x184   : > { %v957_v25 = vpop.f32.mrb[8].mxu0  ;;  %v702_v26 = vpop.f32.mrb[9].mxu1  ;;  %1195 = vst [vmem:[%s2138_s19 + $0x38] sm:$0xff] %v954_v23 }
 0x185   : > { %v958_v27 = vadd.f32 %v957_v25, %v700_v24  ;;  %v959_v28 = vpop.f32.mrb[9].mxu0 }
 0x186   : > { %v960_v29 = vadd.f32 %v959_v28, %v702_v26 }
 0x187   : > { %v706_v30 = vpop.f32.mrb[10].mxu1  ;;  %1196 = vst [vmem:[%s2138_s19 + $0x40] sm:$0xff] %v958_v27 }
 0x188   : > { %v963_v31 = vpop.f32.mrb[10].mxu0  ;;  %v708_v32 = vpop.f32.mrb[11].mxu1  ;;  %1197 = vst [vmem:[%s2138_s19 + $0x48] sm:$0xff] %v960_v29 }
 0x189   : > { %v964_v33 = vadd.f32 %v963_v31, %v706_v30  ;;  %v965_v34 = vpop.f32.mrb[11].mxu0 }
 0x18a   : > { %v966_v35 = vadd.f32 %v965_v34, %v708_v32 }
 0x18b   : > { %v712_v36 = vpop.f32.mrb[12].mxu1  ;;  %1198 = vst [vmem:[%s2138_s19 + $0x50] sm:$0xff] %v964_v33 }
 0x18c   : > { %v969_v37 = vpop.f32.mrb[12].mxu0  ;;  %v714_v38 = vpop.f32.mrb[13].mxu1  ;;  %1199 = vst [vmem:[%s2138_s19 + $0x58] sm:$0xff] %v966_v35 }
 0x18d   : > { %v970_v39 = vadd.f32 %v969_v37, %v712_v36  ;;  %v971_v40 = vpop.f32.mrb[13].mxu0 }
 0x18e   : > { %v972_v41 = vadd.f32 %v971_v40, %v714_v38 }
 0x18f   : > { %v718_v42 = vpop.f32.mrb[14].mxu1  ;;  %1200 = vst [vmem:[%s2138_s19 + $0x60] sm:$0xff] %v970_v39 }
 0x190   : > { %v975_v43 = vpop.f32.mrb[14].mxu0  ;;  %v720_v44 = vpop.f32.mrb[15].mxu1  ;;  %1201 = vst [vmem:[%s2138_s19 + $0x68] sm:$0xff] %v972_v41 }
 0x191   : > { %v976_v45 = vadd.f32 %v975_v43, %v718_v42  ;;  %v977_v46 = vpop.f32.mrb[15].mxu0 }
 0x192   : > { %v978_v47 = vadd.f32 %v977_v46, %v720_v44 }
 0x193   : > { %v724_v48 = vpop.f32.mrb[16].mxu1  ;;  %1202 = vst [vmem:[%s2138_s19 + $0x70] sm:$0xff] %v976_v45 }
 0x194   : > { %v981_v49 = vpop.f32.mrb[16].mxu0  ;;  %v726_v50 = vpop.f32.mrb[17].mxu1  ;;  %1203 = vst [vmem:[%s2138_s19 + $0x78] sm:$0xff] %v978_v47 }
 0x195   : > { %v982_v51 = vadd.f32 %v981_v49, %v724_v48  ;;  %v983_v52 = vpop.f32.mrb[17].mxu0 }
 0x196   : > { %v984_v53 = vadd.f32 %v983_v52, %v726_v50 }
 0x197   : > { %v730_v54 = vpop.f32.mrb[18].mxu1  ;;  %1204 = vst [vmem:[%s2138_s19 + $0x80] sm:$0xff] %v982_v51 }
 0x198   : > { %v987_v55 = vpop.f32.mrb[18].mxu0  ;;  %v732_v56 = vpop.f32.mrb[19].mxu1  ;;  %1205 = vst [vmem:[%s2138_s19 + $0x88] sm:$0xff] %v984_v53 }
 0x199   : > { %v988_v57 = vadd.f32 %v987_v55, %v730_v54  ;;  %v989_v58 = vpop.f32.mrb[19].mxu0 }
 0x19a   : > { %v990_v59 = vadd.f32 %v989_v58, %v732_v56 }
 0x19b   : > { %v736_v60 = vpop.f32.mrb[20].mxu1  ;;  %1206 = vst [vmem:[%s2138_s19 + $0x90] sm:$0xff] %v988_v57 }
 0x19c   : > { %v993_v61 = vpop.f32.mrb[20].mxu0  ;;  %v738_v62 = vpop.f32.mrb[21].mxu1  ;;  %1207 = vst [vmem:[%s2138_s19 + $0x98] sm:$0xff] %v990_v59 }
 0x19d   : > { %v994_v63 = vadd.f32 %v993_v61, %v736_v60  ;;  %v995_v0 = vpop.f32.mrb[21].mxu0 }
 0x19e   : > { %v996_v1 = vadd.f32 %v995_v0, %v738_v62 }
 0x19f   : > { %v742_v2 = vpop.f32.mrb[22].mxu1  ;;  %1208 = vst [vmem:[%s2138_s19 + $0xa0] sm:$0xff] %v994_v63 }
 0x1a0   : > { %v999_v3 = vpop.f32.mrb[22].mxu0  ;;  %v744_v4 = vpop.f32.mrb[23].mxu1  ;;  %1209 = vst [vmem:[%s2138_s19 + $0xa8] sm:$0xff] %v996_v1 }
 0x1a1   : > { %v1000_v5 = vadd.f32 %v999_v3, %v742_v2  ;;  %v1001_v6 = vpop.f32.mrb[23].mxu0 }
 0x1a2   : > { %v1002_v7 = vadd.f32 %v1001_v6, %v744_v4 }
 0x1a3   : > { %v748_v8 = vpop.f32.mrb[24].mxu1  ;;  %1210 = vst [vmem:[%s2138_s19 + $0xb0] sm:$0xff] %v1000_v5 }
 0x1a4   : > { %v1005_v9 = vpop.f32.mrb[24].mxu0  ;;  %v750_v10 = vpop.f32.mrb[25].mxu1  ;;  %1211 = vst [vmem:[%s2138_s19 + $0xb8] sm:$0xff] %v1002_v7 }
 0x1a5   : > { %v1006_v11 = vadd.f32 %v1005_v9, %v748_v8  ;;  %v1007_v12 = vpop.f32.mrb[25].mxu0 }
 0x1a6   : > { %v1008_v13 = vadd.f32 %v1007_v12, %v750_v10 }
 0x1a7   : > { %v754_v14 = vpop.f32.mrb[26].mxu1  ;;  %1212 = vst [vmem:[%s2138_s19 + $0xc0] sm:$0xff] %v1006_v11 }
 0x1a8   : > { %v1011_v15 = vpop.f32.mrb[26].mxu0  ;;  %v756_v16 = vpop.f32.mrb[27].mxu1  ;;  %1213 = vst [vmem:[%s2138_s19 + $0xc8] sm:$0xff] %v1008_v13 }
 0x1a9   : > { %v1012_v17 = vadd.f32 %v1011_v15, %v754_v14  ;;  %v1013_v18 = vpop.f32.mrb[27].mxu0 }
 0x1aa   : > { %v1014_v19 = vadd.f32 %v1013_v18, %v756_v16 }
 0x1ab   : > { %v760_v20 = vpop.f32.mrb[28].mxu1  ;;  %1214 = vst [vmem:[%s2138_s19 + $0xd0] sm:$0xff] %v1012_v17 }
 0x1ac   : > { %v1017_v21 = vpop.f32.mrb[28].mxu0  ;;  %v762_v22 = vpop.f32.mrb[29].mxu1  ;;  %1215 = vst [vmem:[%s2138_s19 + $0xd8] sm:$0xff] %v1014_v19 }
 0x1ad   : > { %v1018_v23 = vadd.f32 %v1017_v21, %v760_v20  ;;  %v1019_v24 = vpop.f32.mrb[29].mxu0 }
 0x1ae   : > { %v1020_v25 = vadd.f32 %v1019_v24, %v762_v22 }
 0x1af   : > { %v766_v26 = vpop.f32.mrb[30].mxu1  ;;  %1216 = vst [vmem:[%s2138_s19 + $0xe0] sm:$0xff] %v1018_v23 }
 0x1b0   : > { %v1023_v27 = vpop.f32.mrb[30].mxu0  ;;  %v768_v28 = vpop.f32.mrb[31].mxu1  ;;  %1217 = vst [vmem:[%s2138_s19 + $0xe8] sm:$0xff] %v1020_v25 }
 0x1b1   : > { %v1024_v29 = vadd.f32 %v1023_v27, %v766_v26  ;;  %v1025_v30 = vpop.f32.mrb[31].mxu0 }
 0x1b2   : > { %v1026_v31 = vadd.f32 %v1025_v30, %v768_v28 }
 0x1b3   : > { %v772_v32 = vpop.f32.mrb[32].mxu1  ;;  %1218 = vst [vmem:[%s2138_s19 + $0xf0] sm:$0xff] %v1024_v29 }
 0x1b4   : > { %v1029_v33 = vpop.f32.mrb[32].mxu0  ;;  %v774_v34 = vpop.f32.mrb[33].mxu1  ;;  %1219 = vst [vmem:[%s2138_s19 + $0xf8] sm:$0xff] %v1026_v31 }
 0x1b5   : > { %v1030_v35 = vadd.f32 %v1029_v33, %v772_v32  ;;  %v1031_v36 = vpop.f32.mrb[33].mxu0 }
 0x1b6   : > { %v1032_v37 = vadd.f32 %v1031_v36, %v774_v34 }
 0x1b7   : > { %v778_v38 = vpop.f32.mrb[34].mxu1  ;;  %1220 = vst [vmem:[%s2138_s19 + $0x100] sm:$0xff] %v1030_v35 }
 0x1b8   : > { %v1035_v39 = vpop.f32.mrb[34].mxu0  ;;  %v780_v40 = vpop.f32.mrb[35].mxu1  ;;  %1221 = vst [vmem:[%s2138_s19 + $0x108] sm:$0xff] %v1032_v37 }
 0x1b9   : > { %v1036_v41 = vadd.f32 %v1035_v39, %v778_v38  ;;  %v1037_v42 = vpop.f32.mrb[35].mxu0 }
 0x1ba   : > { %v1038_v43 = vadd.f32 %v1037_v42, %v780_v40 }
 0x1bb   : > { %v784_v44 = vpop.f32.mrb[36].mxu1  ;;  %1222 = vst [vmem:[%s2138_s19 + $0x110] sm:$0xff] %v1036_v41 }
 0x1bc   : > { %v1041_v45 = vpop.f32.mrb[36].mxu0  ;;  %v786_v46 = vpop.f32.mrb[37].mxu1  ;;  %1223 = vst [vmem:[%s2138_s19 + $0x118] sm:$0xff] %v1038_v43 }
 0x1bd   : > { %v1042_v47 = vadd.f32 %v1041_v45, %v784_v44  ;;  %v1043_v48 = vpop.f32.mrb[37].mxu0 }
 0x1be   : > { %v1044_v49 = vadd.f32 %v1043_v48, %v786_v46 }
 0x1bf   : > { %v790_v50 = vpop.f32.mrb[38].mxu1  ;;  %1224 = vst [vmem:[%s2138_s19 + $0x120] sm:$0xff] %v1042_v47 }
 0x1c0   : > { %v1047_v51 = vpop.f32.mrb[38].mxu0  ;;  %v792_v52 = vpop.f32.mrb[39].mxu1  ;;  %1225 = vst [vmem:[%s2138_s19 + $0x128] sm:$0xff] %v1044_v49 }
 0x1c1   : > { %v1048_v53 = vadd.f32 %v1047_v51, %v790_v50  ;;  %v1049_v54 = vpop.f32.mrb[39].mxu0 }
 0x1c2   : > { %v1050_v55 = vadd.f32 %v1049_v54, %v792_v52 }
 0x1c3   : > { %v796_v56 = vpop.f32.mrb[40].mxu1  ;;  %1226 = vst [vmem:[%s2138_s19 + $0x130] sm:$0xff] %v1048_v53 }
 0x1c4   : > { %v1053_v57 = vpop.f32.mrb[40].mxu0  ;;  %v798_v58 = vpop.f32.mrb[41].mxu1  ;;  %1227 = vst [vmem:[%s2138_s19 + $0x138] sm:$0xff] %v1050_v55 }
 0x1c5   : > { %v1054_v59 = vadd.f32 %v1053_v57, %v796_v56  ;;  %v1055_v60 = vpop.f32.mrb[41].mxu0 }
 0x1c6   : > { %v1056_v61 = vadd.f32 %v1055_v60, %v798_v58 }
 0x1c7   : > { %v802_v62 = vpop.f32.mrb[42].mxu1  ;;  %1228 = vst [vmem:[%s2138_s19 + $0x140] sm:$0xff] %v1054_v59 }
 0x1c8   : > { %v1059_v63 = vpop.f32.mrb[42].mxu0  ;;  %v804_v0 = vpop.f32.mrb[43].mxu1  ;;  %1229 = vst [vmem:[%s2138_s19 + $0x148] sm:$0xff] %v1056_v61 }
 0x1c9   : > { %v1060_v1 = vadd.f32 %v1059_v63, %v802_v62  ;;  %v1061_v2 = vpop.f32.mrb[43].mxu0 }
 0x1ca   : > { %v1062_v3 = vadd.f32 %v1061_v2, %v804_v0 }
 0x1cb   : > { %v808_v4 = vpop.f32.mrb[44].mxu1  ;;  %1230 = vst [vmem:[%s2138_s19 + $0x150] sm:$0xff] %v1060_v1 }
 0x1cc   : > { %v1065_v5 = vpop.f32.mrb[44].mxu0  ;;  %v810_v6 = vpop.f32.mrb[45].mxu1  ;;  %1231 = vst [vmem:[%s2138_s19 + $0x158] sm:$0xff] %v1062_v3 }
 0x1cd   : > { %v1066_v7 = vadd.f32 %v1065_v5, %v808_v4  ;;  %v1067_v8 = vpop.f32.mrb[45].mxu0 }
 0x1ce   : > { %v1068_v9 = vadd.f32 %v1067_v8, %v810_v6 }
 0x1cf   : > { %v814_v10 = vpop.f32.mrb[46].mxu1  ;;  %1232 = vst [vmem:[%s2138_s19 + $0x160] sm:$0xff] %v1066_v7 }
 0x1d0   : > { %v1071_v11 = vpop.f32.mrb[46].mxu0  ;;  %v816_v12 = vpop.f32.mrb[47].mxu1  ;;  %1233 = vst [vmem:[%s2138_s19 + $0x168] sm:$0xff] %v1068_v9 }
 0x1d1   : > { %v1072_v13 = vadd.f32 %v1071_v11, %v814_v10  ;;  %v1073_v14 = vpop.f32.mrb[47].mxu0 }
 0x1d2   : > { %v1074_v15 = vadd.f32 %v1073_v14, %v816_v12 }
 0x1d3   : > { %v820_v16 = vpop.f32.mrb[48].mxu1  ;;  %1234 = vst [vmem:[%s2138_s19 + $0x170] sm:$0xff] %v1072_v13 }
 0x1d4   : > { %v1077_v17 = vpop.f32.mrb[48].mxu0  ;;  %v822_v18 = vpop.f32.mrb[49].mxu1  ;;  %1235 = vst [vmem:[%s2138_s19 + $0x178] sm:$0xff] %v1074_v15 }
 0x1d5   : > { %v1078_v19 = vadd.f32 %v1077_v17, %v820_v16  ;;  %v1079_v20 = vpop.f32.mrb[49].mxu0 }
 0x1d6   : > { %v1080_v21 = vadd.f32 %v1079_v20, %v822_v18 }
 0x1d7   : > { %v826_v22 = vpop.f32.mrb[50].mxu1  ;;  %1236 = vst [vmem:[%s2138_s19 + $0x180] sm:$0xff] %v1078_v19 }
 0x1d8   : > { %v1083_v23 = vpop.f32.mrb[50].mxu0  ;;  %v828_v24 = vpop.f32.mrb[51].mxu1  ;;  %1237 = vst [vmem:[%s2138_s19 + $0x188] sm:$0xff] %v1080_v21 }
 0x1d9   : > { %v1084_v25 = vadd.f32 %v1083_v23, %v826_v22  ;;  %v1085_v26 = vpop.f32.mrb[51].mxu0 }
 0x1da   : > { %v1086_v27 = vadd.f32 %v1085_v26, %v828_v24 }
 0x1db   : > { %v832_v28 = vpop.f32.mrb[52].mxu1  ;;  %1238 = vst [vmem:[%s2138_s19 + $0x190] sm:$0xff] %v1084_v25 }
 0x1dc   : > { %v1089_v29 = vpop.f32.mrb[52].mxu0  ;;  %v834_v30 = vpop.f32.mrb[53].mxu1  ;;  %1239 = vst [vmem:[%s2138_s19 + $0x198] sm:$0xff] %v1086_v27 }
 0x1dd   : > { %v1090_v31 = vadd.f32 %v1089_v29, %v832_v28  ;;  %v1091_v32 = vpop.f32.mrb[53].mxu0 }
 0x1de   : > { %v1092_v33 = vadd.f32 %v1091_v32, %v834_v30 }
 0x1df   : > { %v838_v34 = vpop.f32.mrb[54].mxu1  ;;  %1240 = vst [vmem:[%s2138_s19 + $0x1a0] sm:$0xff] %v1090_v31 }
 0x1e0   : > { %v1095_v35 = vpop.f32.mrb[54].mxu0  ;;  %v840_v36 = vpop.f32.mrb[55].mxu1  ;;  %1241 = vst [vmem:[%s2138_s19 + $0x1a8] sm:$0xff] %v1092_v33 }
 0x1e1   : > { %v1096_v37 = vadd.f32 %v1095_v35, %v838_v34  ;;  %v1097_v38 = vpop.f32.mrb[55].mxu0 }
 0x1e2   : > { %v1098_v39 = vadd.f32 %v1097_v38, %v840_v36 }
 0x1e3   : > { %v844_v40 = vpop.f32.mrb[56].mxu1  ;;  %1242 = vst [vmem:[%s2138_s19 + $0x1b0] sm:$0xff] %v1096_v37 }
 0x1e4   : > { %v1101_v41 = vpop.f32.mrb[56].mxu0  ;;  %v846_v42 = vpop.f32.mrb[57].mxu1  ;;  %1243 = vst [vmem:[%s2138_s19 + $0x1b8] sm:$0xff] %v1098_v39 }
 0x1e5   : > { %v1102_v43 = vadd.f32 %v1101_v41, %v844_v40  ;;  %v1103_v44 = vpop.f32.mrb[57].mxu0 }
 0x1e6   : > { %v1104_v45 = vadd.f32 %v1103_v44, %v846_v42 }
 0x1e7   : > { %v850_v46 = vpop.f32.mrb[58].mxu1  ;;  %1244 = vst [vmem:[%s2138_s19 + $0x1c0] sm:$0xff] %v1102_v43 }
 0x1e8   : > { %v1107_v47 = vpop.f32.mrb[58].mxu0  ;;  %v852_v48 = vpop.f32.mrb[59].mxu1  ;;  %1245 = vst [vmem:[%s2138_s19 + $0x1c8] sm:$0xff] %v1104_v45 }
 0x1e9   : > { %v1108_v49 = vadd.f32 %v1107_v47, %v850_v46  ;;  %v1109_v50 = vpop.f32.mrb[59].mxu0 }
 0x1ea   : > { %v1110_v51 = vadd.f32 %v1109_v50, %v852_v48 }
 0x1eb   : > { %v856_v52 = vpop.f32.mrb[60].mxu1  ;;  %1246 = vst [vmem:[%s2138_s19 + $0x1d0] sm:$0xff] %v1108_v49 }
 0x1ec   : > { %v1113_v53 = vpop.f32.mrb[60].mxu0  ;;  %v858_v54 = vpop.f32.mrb[61].mxu1  ;;  %1247 = vst [vmem:[%s2138_s19 + $0x1d8] sm:$0xff] %v1110_v51 }
 0x1ed   : > { %v1114_v55 = vadd.f32 %v1113_v53, %v856_v52  ;;  %v1115_v56 = vpop.f32.mrb[61].mxu0 }
 0x1ee   : > { %v1116_v57 = vadd.f32 %v1115_v56, %v858_v54 }
 0x1ef   : > { %v862_v58 = vpop.f32.mrb[62].mxu1  ;;  %1248 = vst [vmem:[%s2138_s19 + $0x1e0] sm:$0xff] %v1114_v55 }
 0x1f0   : > { %v1119_v59 = vpop.f32.mrb[62].mxu0  ;;  %v864_v60 = vpop.f32.mrb[63].mxu1  ;;  %1249 = vst [vmem:[%s2138_s19 + $0x1e8] sm:$0xff] %v1116_v57 }
 0x1f1   : > { %v1120_v61 = vadd.f32 %v1119_v59, %v862_v58  ;;  %v1121_v62 = vpop.f32.mrb[63].mxu0 }
 0x1f2   : > { %v1122_v63 = vadd.f32 %v1121_v62, %v864_v60 }
 0x1f3   : > { %1250 = vst [vmem:[%s2138_s19 + $0x1f0] sm:$0xff] %v1120_v61 }
 0x1f4   : > { %1251 = vst [vmem:[%s2138_s19 + $0x1f8] sm:$0xff] %v1122_v63 }
 0x1f5   : > { %1739 = shalt.err (!%p1736_p6)
}
 0x1f6   : > { %s1740_s24 = scalar_lea.hbm %s2207_s15, 8192  ;;  %s1744_s3 = scalar_lea.hbm %s2262_s2, 16384 }
 0x1f7   : > { %p1741_p0 = scmp.ne.s32.totalorder %s2207_s15, %s1740_s24  ;;  %p1745_p12 = scmp.lt.u32.totalorder %s2207_s15, %s2262_s2 }
 0x1f8   : > { %p1746_p5 = scmp.lt.u32.totalorder %s1744_s3, %s1740_s24  ;;  %p1748_p9 = scmp.lt.u32.totalorder %s1740_s24, %s2207_s15 }
 0x1f9   : > { %p1742_p2 = pnand %p1741_p0, %p2281_p11 }
 0x1fa   : > { %p1747_p8 = por %p1746_p5, %p1745_p12 }
 0x1fb   : > { %p1743_p7 = pneg %p1742_p2 }
 0x1fc   : > { %p1749_p13 = por %p1748_p9, %p1747_p8 }
 0x1fe   : > { %p1750_p4 = pnand %p1749_p13, %p1743_p7 }
 0x200   : > { %1753 = shalt.err (!%p1750_p4)
}
 0x201   : > { %s1821_s17 = smov 256   ;;  %s1822_s19 = smov 512  }
 0x202   : > { %s1823_s22 = smov 16  }
 0x203   : > { %1593 = dma.vmem_to_hbm [thread:$0]  (%p2281_p11), %s2209_s8, 8192, %s2207_s15, %s1253_s12, %s1821_s17, %s1822_s19, %s1823_s22  }
 0x204 PF: > { %s1284_s5 = sand.u32 1, %s1792_s9   ;;  %p2282_p1 = scmp.ne.s32.totalorder %s2273_s21, 0 }
 0x205   : > { %p2283_p10 = scmp.ge.s32.totalorder %s1812_s14, 2  ;;  %s1285_s6 = scalar_lea.sflag [#allocation4], %s1284_s5 }
 0x207   : > { %p1604_p3 = pnand %p2283_p10, %p2282_p1 }
 0x209   : > { %1787 = dma.done.wait (!%p1604_p3), %s1285_s6, 8192  }
 0x20a   : > { %1789 = vsyncadd (!%p1604_p3), %s1285_s6, 4294959104  ;;  %s19_s14 = sadd.s32 1, %s1812_s14   ;;  %s2284_s9 = smov %s1796_s10 }
 0x20b   : > { %p16_p6 = scmp.ge.s32.totalorder %s19_s14, 4   ;;  %s2285_s10 = smov %s1800_s11 }
 0x20c   : > { %s2286_s11 = smov %s1959_s7  ;;  %s2287_s12 = smov %s1808_s13 }
 0x20d   : > { %s2288_s13 = smov %s2290_s27  ;;  %18 = sbr.rel (!%p16_p6) target bundleno = 7 (0x7), region = 83 }
 0x214   :  { %1290 = vsyncpa [#allocation3], 1 }
 0x215   :  { %1292 = vsyncpa [#allocation3 + $0x1], 1 }
 0x216   :  { %1293 = vsyncpa [#allocation6], 1 }
 0x217   :  { %1295 = vsyncpa [#allocation6 + $0x1], 1 }
 0x218   :  { %1296 = vsyncpa [#allocation4], 1 }
 0x219   :  { %1298 = vsyncpa [#allocation4 + $0x1], 1 }

</bundles_post_ra>
